<compile_context>
chip_gen: v7x
topology: tpu7x:2x2x1
jax: 0.10.0
libtpu: 0.0.40
codegen_flags: <defaults>
</compile_context>

<pallas_src>
import jax
import jax.numpy as jnp
from jax import lax
from jax.experimental import pallas as pl
from jax.experimental.pallas import tpu as pltpu


# ---------------------------------------------------------------------------
# Pallas kernel: full forward pass for ONE graph (one grid step)
# ---------------------------------------------------------------------------
def gnn_kernel(x_ref, a_ref, m_ref,
               w1_ref, b1_ref, w2_ref, b2_ref,
               gnw_ref, gnb_ref, gnm_ref,
               w3_ref, b3_ref, w4_ref, b4_ref,
               out_ref):
    f32, bf16 = jnp.float32, jnp.bfloat16

    x = x_ref[0]            # [NPG, F_in] f32 node features of this graph
    a = a_ref[0]            # [NPG, NPG]  bf16 mean-aggregation block
    mask = m_ref[0]         # [NPG, 1]    f32, 1 = valid node, 0 = padding
    gnw = gnw_ref[...]      # [1, H] GraphNorm weight
    gnb = gnb_ref[...]      # [1, H] GraphNorm bias
    gnm = gnm_ref[...]      # [1, H] GraphNorm mean_scale

    cnt = jnp.sum(mask)
    inv_cnt = 1.0 / jnp.maximum(cnt, 1.0)   # guard against empty graphs

    def sage(h, w_cat, b):
        # SAGEConv: lin_l(mean_{j in N(i)} h_j) + lin_r(h_i); bias lives in lin_l.
        # bf16 MXU inputs, f32 accumulation.
        agg = jnp.dot(a, h.astype(bf16), preferred_element_type=f32)
        cat = jnp.concatenate([agg, h], axis=-1).astype(bf16)      # [NPG, 2F]
        return jnp.dot(cat, w_cat, preferred_element_type=f32) + b

    def graph_norm(h):
        # PyG GraphNorm over this graph's valid nodes only.
        mean = jnp.sum(h * mask, axis=0, keepdims=True) * inv_cnt          # [1, H]
        centered = h - mean * gnm
        var = jnp.sum(centered * centered * mask, axis=0, keepdims=True) * inv_cnt
        return gnw * centered * lax.rsqrt(var + 1e-5) + gnb

    h = jnp.maximum(sage(x, w1_ref[...], b1_ref[...]), 0.0)
    h = graph_norm(h)
    h = jnp.maximum(sage(h, w2_ref[...], b2_ref[...]), 0.0)
    h = graph_norm(h)

    # global_max_pool over this graph's valid nodes (no [G,N,H] broadcast)
    neg = jnp.finfo(f32).min
    pooled = jnp.max(jnp.where(mask > 0.5, h, neg), axis=0, keepdims=True)  # [1, H]

    # dropout == identity at inference
    z = jnp.maximum(
        jnp.dot(pooled, w3_ref[...], preferred_element_type=f32) + b3_ref[...], 0.0)
    out_ref[0] = jnp.dot(z, w4_ref[...], preferred_element_type=f32) + b4_ref[...]


# ---------------------------------------------------------------------------
# Wrapper: graph-tiled grid, resident weights, parallel semantics
# ---------------------------------------------------------------------------
def isaac_gnn_forward(x_g, a_blk, mask, params,
                      *, vmem_limit_bytes=64 * 1024 * 1024):
    """x_g: [G, NPG, F_in] f32, a_blk: [G, NPG, NPG] bf16 (block-diag mean-agg),
    mask: [G, NPG, 1] f32 node-validity mask."""
    G, NPG, _ = x_g.shape
    C = params["w4"].shape[1]

    def graph_block(shape):
        nd = len(shape)
        return pl.BlockSpec((1,) + tuple(shape[1:]),
                            lambda g, _nd=nd: (g,) + (0,) * (_nd - 1))

    def resident(t):
        # Constant index map -> DMA'd once, stays resident across grid steps.
        return pl.BlockSpec(t.shape, lambda g, _nd=t.ndim: (0,) * _nd)

    weights = (params["w1"], params["b1"], params["w2"], params["b2"],
               params["gnw"], params["gnb"], params["gnm"],
               params["w3"], params["b3"], params["w4"], params["b4"])

    in_specs = [graph_block(x_g.shape),
                graph_block(a_blk.shape),
                graph_block(mask.shape)]
    in_specs += [resident(t) for t in weights]

    out = pl.pallas_call(
        gnn_kernel,
        grid=(G,),
        in_specs=in_specs,
        out_specs=pl.BlockSpec((1, 1, C), lambda g: (g, 0, 0)),
        out_shape=jax.ShapeDtypeStruct((G, 1, C), jnp.float32),
        compiler_params=pltpu.CompilerParams(
            dimension_semantics=("parallel",),
            vmem_limit_bytes=vmem_limit_bytes),
    )(x_g, a_blk, mask, *weights)

    out = out.reshape(G, C)
    return jnp.squeeze(out, axis=-1) if C == 1 else out


# ---------------------------------------------------------------------------
# Pure-JAX f32 reference (dense, un-fused) for a correctness check
# ---------------------------------------------------------------------------
def ref_forward(x, A, P, Pt, cnt, p):
    def sage(h, wl, wr, b):
        return A @ h @ wl + h @ wr + b

    def graph_norm(h):
        mean_n = Pt @ (P @ h / cnt)
        centered = h - mean_n * p["gnm"]
        var_n = Pt @ (P @ (centered * centered) / cnt)
        return p["gnw"] * centered / jnp.sqrt(var_n + 1e-5) + p["gnb"]

    h = jax.nn.relu(sage(x, p["w1l"], p["w1r"], p["b1"]))
    h = graph_norm(h)
    h = jax.nn.relu(sage(h, p["w2l"], p["w2r"], p["b2"]))
    h = graph_norm(h)
    neg = jnp.finfo(jnp.float32).min
    pooled = jnp.max(jnp.where(P[:, :, None] > 0.5, h[None], neg), axis=1)
    z = jax.nn.relu(pooled @ p["w3"] + p["b3"])
    out = z @ p["w4"] + p["b4"]
    return jnp.squeeze(out, axis=-1) if out.shape[-1] == 1 else out


if __name__ == "__main__":
    # Small, deterministic synthetic problem (contiguous equal-size graphs).
    N, F_IN, H, G, OUT_C = 64, 16, 32, 4, 1
    NPG = N // G  # nodes per graph

    key = jax.random.PRNGKey(0)
    keys = jax.random.split(key, 8)

    x = jax.random.normal(keys[0], (N, F_IN), dtype=jnp.float32)

    # Deterministic edges: bidirectional ring within each graph.
    nodes = jnp.arange(N)
    graph_of = nodes // NPG
    nxt = (nodes + 1) % NPG + graph_of * NPG
    src = jnp.concatenate([nodes, nxt])
    dst = jnp.concatenate([nxt, nodes])

    # Dense mean-aggregation matrix A[t, s] = 1 / in_deg(t)  (reference layout).
    A = jnp.zeros((N, N), dtype=jnp.float32).at[dst, src].add(1.0)
    deg = jnp.sum(A, axis=1, keepdims=True)
    A = A / jnp.maximum(deg, 1.0)

    # Kernel layout: per-graph blocks (A is block-diagonal by construction).
    x_g = x.reshape(G, NPG, F_IN)
    A_blk = jnp.stack(
        [A[g * NPG:(g + 1) * NPG, g * NPG:(g + 1) * NPG] for g in range(G)]
    ).astype(jnp.bfloat16)
    mask = jnp.ones((G, NPG, 1), jnp.float32)

    # Dense structures only for the reference.
    P = (graph_of[None, :] == jnp.arange(G)[:, None]).astype(jnp.float32)
    Pt = P.T
    cnt = jnp.sum(P, axis=1, keepdims=True)

    # Deterministic parameters (GraphNorm defaults: weight=1, bias=0, mean_scale=1).
    s = 0.1
    w1l = s * jax.random.normal(keys[1], (F_IN, H), jnp.float32)
    w1r = s * jax.random.normal(keys[2], (F_IN, H), jnp.float32)
    w2l = s * jax.random.normal(keys[3], (H, H), jnp.float32)
    w2r = s * jax.random.normal(keys[4], (H, H), jnp.float32)
    w3 = s * jax.random.normal(keys[5], (H, H // 2), jnp.float32)
    w4 = s * jax.random.normal(keys[6], (H // 2, OUT_C), jnp.float32)
    b1 = jnp.full((1, H), 0.01, jnp.float32)
    b2 = jnp.full((1, H), 0.01, jnp.float32)
    b3 = jnp.full((1, H // 2), 0.01, jnp.float32)
    b4 = jnp.full((1, OUT_C), 0.01, jnp.float32)
    gnw = jnp.ones((1, H), jnp.float32)
    gnb = jnp.zeros((1, H), jnp.float32)
    gnm = jnp.ones((1, H), jnp.float32)

    params = {
        # fused SAGE weights [[W_l],[W_r]], bf16 for the MXU
        "w1": jnp.concatenate([w1l, w1r], axis=0).astype(jnp.bfloat16),
        "w2": jnp.concatenate([w2l, w2r], axis=0).astype(jnp.bfloat16),
        "b1": b1, "b2": b2,
        "gnw": gnw, "gnb": gnb, "gnm": gnm,
        "w3": w3, "b3": b3, "w4": w4, "b4": b4,
    }

    out = isaac_gnn_forward(x_g, A_blk, mask, params)
    out = jax.block_until_ready(out)

    rparams = {"w1l": w1l, "w1r": w1r, "b1": b1,
               "w2l": w2l, "w2r": w2r, "b2": b2,
               "gnw": gnw, "gnb": gnb, "gnm": gnm,
               "w3": w3, "b3": b3, "w4": w4, "b4": b4}
    ref = ref_forward(x, A, P, Pt, cnt, rparams)

    assert out.shape == (G,), out.shape
    # Tolerance loosened vs the f32-only version: A and the SAGE weights are
    # fed to the MXU in bf16 (accumulation kept in f32 via preferred_element_type).
    assert jnp.allclose(out, ref, rtol=5e-2, atol=5e-2), (out, ref)

    print("KERNEL_OK")
</pallas_src>

<mosaic_0001>
module attributes {stable_mosaic.version = 11 : i64} {
  func.func @gnn_kernel(%arg0: i32, %arg1: memref<1x16x16xf32, #tpu.memory_space<vmem>>, %arg2: memref<1x16x16xbf16, #tpu.memory_space<vmem>>, %arg3: memref<1x16x1xf32, #tpu.memory_space<vmem>>, %arg4: memref<32x32xbf16, #tpu.memory_space<vmem>>, %arg5: memref<1x32xf32, #tpu.memory_space<vmem>>, %arg6: memref<64x32xbf16, #tpu.memory_space<vmem>>, %arg7: memref<1x32xf32, #tpu.memory_space<vmem>>, %arg8: memref<1x32xf32, #tpu.memory_space<vmem>>, %arg9: memref<1x32xf32, #tpu.memory_space<vmem>>, %arg10: memref<1x32xf32, #tpu.memory_space<vmem>>, %arg11: memref<32x16xf32, #tpu.memory_space<vmem>>, %arg12: memref<1x16xf32, #tpu.memory_space<vmem>>, %arg13: memref<16x1xf32, #tpu.memory_space<vmem>>, %arg14: memref<1x1xf32, #tpu.memory_space<vmem>>, %arg15: memref<1x1x1xf32, #tpu.memory_space<vmem>>) attributes {dimension_semantics = [#tpu.dimension_semantics<parallel>], iteration_bounds = array<i64: 4>, scalar_prefetch = 0 : i64, scratch_operands = 0 : i64, tpu.core_type = #tpu.core_type<tc>, window_params = [{transform_indices = @transform_0, window_bounds = array<i64: 1, 16, 16>}, {transform_indices = @transform_1, window_bounds = array<i64: 1, 16, 16>}, {transform_indices = @transform_2, window_bounds = array<i64: 1, 16, 1>}, {pipeline_mode = #tpu.pipeline_mode<synchronous>, transform_indices = @transform_3, window_bounds = array<i64: 32, 32>}, {pipeline_mode = #tpu.pipeline_mode<synchronous>, transform_indices = @transform_4, window_bounds = array<i64: 1, 32>}, {pipeline_mode = #tpu.pipeline_mode<synchronous>, transform_indices = @transform_5, window_bounds = array<i64: 64, 32>}, {pipeline_mode = #tpu.pipeline_mode<synchronous>, transform_indices = @transform_6, window_bounds = array<i64: 1, 32>}, {pipeline_mode = #tpu.pipeline_mode<synchronous>, transform_indices = @transform_7, window_bounds = array<i64: 1, 32>}, {pipeline_mode = #tpu.pipeline_mode<synchronous>, transform_indices = @transform_8, window_bounds = array<i64: 1, 32>}, {pipeline_mode = #tpu.pipeline_mode<synchronous>, transform_indices = @transform_9, window_bounds = array<i64: 1, 32>}, {pipeline_mode = #tpu.pipeline_mode<synchronous>, transform_indices = @transform_10, window_bounds = array<i64: 32, 16>}, {pipeline_mode = #tpu.pipeline_mode<synchronous>, transform_indices = @transform_11, window_bounds = array<i64: 1, 16>}, {pipeline_mode = #tpu.pipeline_mode<synchronous>, transform_indices = @transform_12, window_bounds = array<i64: 16, 1>}, {pipeline_mode = #tpu.pipeline_mode<synchronous>, transform_indices = @transform_13, window_bounds = array<i64: 1, 1>}, {transform_indices = @transform_14, window_bounds = array<i64: 1, 1, 1>}]} {
    %c0 = arith.constant 0 : index
    %c0_0 = arith.constant 0 : index
    %c0_1 = arith.constant 0 : index
    %0 = vector.load %arg1[%c0, %c0_0, %c0_1] : memref<1x16x16xf32, #tpu.memory_space<vmem>>, vector<1x16x16xf32>
    %1 = vector.shape_cast %0 : vector<1x16x16xf32> to vector<16x16xf32>
    %c0_2 = arith.constant 0 : index
    %c0_3 = arith.constant 0 : index
    %c0_4 = arith.constant 0 : index
    %2 = vector.load %arg2[%c0_2, %c0_3, %c0_4] : memref<1x16x16xbf16, #tpu.memory_space<vmem>>, vector<1x16x16xbf16>
    %3 = vector.shape_cast %2 : vector<1x16x16xbf16> to vector<16x16xbf16>
    %c0_5 = arith.constant 0 : index
    %c0_6 = arith.constant 0 : index
    %c0_7 = arith.constant 0 : index
    %4 = vector.load %arg3[%c0_5, %c0_6, %c0_7] : memref<1x16x1xf32, #tpu.memory_space<vmem>>, vector<1x16x1xf32>
    %5 = vector.shape_cast %4 : vector<1x16x1xf32> to vector<16x1xf32>
    %c0_8 = arith.constant 0 : index
    %c0_9 = arith.constant 0 : index
    %6 = vector.load %arg8[%c0_8, %c0_9] : memref<1x32xf32, #tpu.memory_space<vmem>>, vector<1x32xf32>
    %c0_10 = arith.constant 0 : index
    %c0_11 = arith.constant 0 : index
    %7 = vector.load %arg9[%c0_10, %c0_11] : memref<1x32xf32, #tpu.memory_space<vmem>>, vector<1x32xf32>
    %c0_12 = arith.constant 0 : index
    %c0_13 = arith.constant 0 : index
    %8 = vector.load %arg10[%c0_12, %c0_13] : memref<1x32xf32, #tpu.memory_space<vmem>>, vector<1x32xf32>
    %9 = vector.shape_cast %5 : vector<16x1xf32> to vector<1x16x1xf32>
    %cst = arith.constant dense<0.000000e+00> : vector<1xf32>
    %10 = vector.multi_reduction <add>, %9, %cst [1, 2] : vector<1x16x1xf32> to vector<1xf32>
    %11 = vector.shape_cast %10 : vector<1xf32> to vector<1x1x1xf32>
    %12 = vector.extract %11[0, 0, 0] : f32 from vector<1x1x1xf32>
    %cst_14 = arith.constant 1.000000e+00 : f32
    %13 = arith.maximumf %12, %cst_14 : f32
    %cst_15 = arith.constant 1.000000e+00 : f32
    %14 = arith.divf %cst_15, %13 : f32
    %c0_16 = arith.constant 0 : index
    %c0_17 = arith.constant 0 : index
    %15 = vector.load %arg4[%c0_16, %c0_17] : memref<32x32xbf16, #tpu.memory_space<vmem>>, vector<32x32xbf16>
    %c0_18 = arith.constant 0 : index
    %c0_19 = arith.constant 0 : index
    %16 = vector.load %arg5[%c0_18, %c0_19] : memref<1x32xf32, #tpu.memory_space<vmem>>, vector<1x32xf32>
    %17 = arith.truncf %1 : vector<16x16xf32> to vector<16x16xbf16>
    %cst_20 = arith.constant dense<0.000000e+00> : vector<16x16xf32>
    %18 = tpu.matmul %3, %17, %cst_20 {dimension_numbers = #tpu.dot_dimension_numbers<[1], [0], [0], [1], [0, 0, 1, 1], [], []>} : vector<16x16xbf16>, vector<16x16xbf16>, vector<16x16xf32> -> vector<16x16xf32>
    %19 = tpu.concatenate %18, %1 in 1 : vector<16x16xf32>, vector<16x16xf32> -> vector<16x32xf32>
    %20 = arith.truncf %19 : vector<16x32xf32> to vector<16x32xbf16>
    %cst_21 = arith.constant dense<0.000000e+00> : vector<16x32xf32>
    %21 = tpu.matmul %20, %15, %cst_21 {dimension_numbers = #tpu.dot_dimension_numbers<[1], [0], [0], [1], [0, 0, 1, 1], [], []>} : vector<16x32xbf16>, vector<32x32xbf16>, vector<16x32xf32> -> vector<16x32xf32>
    %22 = vector.broadcast %16 : vector<1x32xf32> to vector<16x32xf32>
    %23 = arith.addf %21, %22 : vector<16x32xf32>
    %cst_22 = arith.constant 0.000000e+00 : f32
    %24 = vector.broadcast %cst_22 : f32 to vector<16x32xf32>
    %25 = arith.maximumf %23, %24 : vector<16x32xf32>
    %26 = vector.broadcast %5 : vector<16x1xf32> to vector<16x32xf32>
    %27 = arith.mulf %25, %26 : vector<16x32xf32>
    %cst_23 = arith.constant dense<0.000000e+00> : vector<32xf32>
    %28 = vector.multi_reduction <add>, %27, %cst_23 [0] : vector<16x32xf32> to vector<32xf32>
    %29 = vector.shape_cast %28 : vector<32xf32> to vector<1x32xf32>
    %30 = vector.broadcast %14 : f32 to vector<1x32xf32>
    %31 = arith.mulf %29, %30 : vector<1x32xf32>
    %32 = arith.mulf %31, %8 : vector<1x32xf32>
    %33 = vector.broadcast %32 : vector<1x32xf32> to vector<16x32xf32>
    %34 = arith.subf %25, %33 : vector<16x32xf32>
    %35 = arith.mulf %34, %34 : vector<16x32xf32>
    %36 = vector.broadcast %5 : vector<16x1xf32> to vector<16x32xf32>
    %37 = arith.mulf %35, %36 : vector<16x32xf32>
    %cst_24 = arith.constant dense<0.000000e+00> : vector<32xf32>
    %38 = vector.multi_reduction <add>, %37, %cst_24 [0] : vector<16x32xf32> to vector<32xf32>
    %39 = vector.shape_cast %38 : vector<32xf32> to vector<1x32xf32>
    %40 = vector.broadcast %14 : f32 to vector<1x32xf32>
    %41 = arith.mulf %39, %40 : vector<1x32xf32>
    %42 = vector.broadcast %6 : vector<1x32xf32> to vector<16x32xf32>
    %43 = arith.mulf %42, %34 : vector<16x32xf32>
    %cst_25 = arith.constant 9.99999974E-6 : f32
    %44 = vector.broadcast %cst_25 : f32 to vector<1x32xf32>
    %45 = arith.addf %41, %44 : vector<1x32xf32>
    %46 = math.rsqrt %45 : vector<1x32xf32>
    %47 = vector.broadcast %46 : vector<1x32xf32> to vector<16x32xf32>
    %48 = arith.mulf %43, %47 : vector<16x32xf32>
    %49 = vector.broadcast %7 : vector<1x32xf32> to vector<16x32xf32>
    %50 = arith.addf %48, %49 : vector<16x32xf32>
    %c0_26 = arith.constant 0 : index
    %c0_27 = arith.constant 0 : index
    %51 = vector.load %arg6[%c0_26, %c0_27] : memref<64x32xbf16, #tpu.memory_space<vmem>>, vector<64x32xbf16>
    %c0_28 = arith.constant 0 : index
    %c0_29 = arith.constant 0 : index
    %52 = vector.load %arg7[%c0_28, %c0_29] : memref<1x32xf32, #tpu.memory_space<vmem>>, vector<1x32xf32>
    %53 = arith.truncf %50 : vector<16x32xf32> to vector<16x32xbf16>
    %cst_30 = arith.constant dense<0.000000e+00> : vector<16x32xf32>
    %54 = tpu.matmul %3, %53, %cst_30 {dimension_numbers = #tpu.dot_dimension_numbers<[1], [0], [0], [1], [0, 0, 1, 1], [], []>} : vector<16x16xbf16>, vector<16x32xbf16>, vector<16x32xf32> -> vector<16x32xf32>
    %55 = tpu.concatenate %54, %50 in 1 : vector<16x32xf32>, vector<16x32xf32> -> vector<16x64xf32>
    %56 = arith.truncf %55 : vector<16x64xf32> to vector<16x64xbf16>
    %cst_31 = arith.constant dense<0.000000e+00> : vector<16x32xf32>
    %57 = tpu.matmul %56, %51, %cst_31 {dimension_numbers = #tpu.dot_dimension_numbers<[1], [0], [0], [1], [0, 0, 1, 1], [], []>} : vector<16x64xbf16>, vector<64x32xbf16>, vector<16x32xf32> -> vector<16x32xf32>
    %58 = vector.broadcast %52 : vector<1x32xf32> to vector<16x32xf32>
    %59 = arith.addf %57, %58 : vector<16x32xf32>
    %cst_32 = arith.constant 0.000000e+00 : f32
    %60 = vector.broadcast %cst_32 : f32 to vector<16x32xf32>
    %61 = arith.maximumf %59, %60 : vector<16x32xf32>
    %62 = vector.broadcast %5 : vector<16x1xf32> to vector<16x32xf32>
    %63 = arith.mulf %61, %62 : vector<16x32xf32>
    %cst_33 = arith.constant dense<0.000000e+00> : vector<32xf32>
    %64 = vector.multi_reduction <add>, %63, %cst_33 [0] : vector<16x32xf32> to vector<32xf32>
    %65 = vector.shape_cast %64 : vector<32xf32> to vector<1x32xf32>
    %66 = vector.broadcast %14 : f32 to vector<1x32xf32>
    %67 = arith.mulf %65, %66 : vector<1x32xf32>
    %68 = arith.mulf %67, %8 : vector<1x32xf32>
    %69 = vector.broadcast %68 : vector<1x32xf32> to vector<16x32xf32>
    %70 = arith.subf %61, %69 : vector<16x32xf32>
    %71 = arith.mulf %70, %70 : vector<16x32xf32>
    %72 = vector.broadcast %5 : vector<16x1xf32> to vector<16x32xf32>
    %73 = arith.mulf %71, %72 : vector<16x32xf32>
    %cst_34 = arith.constant dense<0.000000e+00> : vector<32xf32>
    %74 = vector.multi_reduction <add>, %73, %cst_34 [0] : vector<16x32xf32> to vector<32xf32>
    %75 = vector.shape_cast %74 : vector<32xf32> to vector<1x32xf32>
    %76 = vector.broadcast %14 : f32 to vector<1x32xf32>
    %77 = arith.mulf %75, %76 : vector<1x32xf32>
    %78 = vector.broadcast %6 : vector<1x32xf32> to vector<16x32xf32>
    %79 = arith.mulf %78, %70 : vector<16x32xf32>
    %cst_35 = arith.constant 9.99999974E-6 : f32
    %80 = vector.broadcast %cst_35 : f32 to vector<1x32xf32>
    %81 = arith.addf %77, %80 : vector<1x32xf32>
    %82 = math.rsqrt %81 : vector<1x32xf32>
    %83 = vector.broadcast %82 : vector<1x32xf32> to vector<16x32xf32>
    %84 = arith.mulf %79, %83 : vector<16x32xf32>
    %85 = vector.broadcast %7 : vector<1x32xf32> to vector<16x32xf32>
    %86 = arith.addf %84, %85 : vector<16x32xf32>
    %cst_36 = arith.constant 5.000000e-01 : f32
    %87 = vector.broadcast %cst_36 : f32 to vector<16x1xf32>
    %88 = arith.cmpf ogt, %5, %87 : vector<16x1xf32>
    %cst_37 = arith.constant -3.40282347E+38 : f32
    %89 = vector.shape_cast %88 : vector<16x1xi1> to vector<16x1xi1>
    %90 = vector.broadcast %89 : vector<16x1xi1> to vector<16x32xi1>
    %91 = vector.broadcast %cst_37 : f32 to vector<16x32xf32>
    %92 = arith.select %90, %86, %91 : vector<16x32xi1>, vector<16x32xf32>
    %cst_38 = arith.constant dense<0xFF800000> : vector<32xf32>
    %93 = vector.multi_reduction <maximumf>, %92, %cst_38 [0] : vector<16x32xf32> to vector<32xf32>
    %94 = vector.shape_cast %93 : vector<32xf32> to vector<1x32xf32>
    %c0_39 = arith.constant 0 : index
    %c0_40 = arith.constant 0 : index
    %95 = vector.load %arg11[%c0_39, %c0_40] : memref<32x16xf32, #tpu.memory_space<vmem>>, vector<32x16xf32>
    %cst_41 = arith.constant dense<0.000000e+00> : vector<1x16xf32>
    %96 = tpu.matmul %94, %95, %cst_41 {dimension_numbers = #tpu.dot_dimension_numbers<[1], [0], [0], [1], [0, 0, 1, 1], [], []>} : vector<1x32xf32>, vector<32x16xf32>, vector<1x16xf32> -> vector<1x16xf32>
    %c0_42 = arith.constant 0 : index
    %c0_43 = arith.constant 0 : index
    %97 = vector.load %arg12[%c0_42, %c0_43] : memref<1x16xf32, #tpu.memory_space<vmem>>, vector<1x16xf32>
    %98 = arith.addf %96, %97 : vector<1x16xf32>
    %cst_44 = arith.constant 0.000000e+00 : f32
    %99 = vector.broadcast %cst_44 : f32 to vector<1x16xf32>
    %100 = arith.maximumf %98, %99 : vector<1x16xf32>
    %c0_45 = arith.constant 0 : index
    %c0_46 = arith.constant 0 : index
    %101 = vector.load %arg13[%c0_45, %c0_46] : memref<16x1xf32, #tpu.memory_space<vmem>>, vector<16x1xf32>
    %cst_47 = arith.constant dense<0.000000e+00> : vector<1x1xf32>
    %102 = tpu.matmul %100, %101, %cst_47 {dimension_numbers = #tpu.dot_dimension_numbers<[1], [0], [0], [1], [0, 0, 1, 1], [], []>} : vector<1x16xf32>, vector<16x1xf32>, vector<1x1xf32> -> vector<1x1xf32>
    %c0_48 = arith.constant 0 : index
    %c0_49 = arith.constant 0 : index
    %103 = vector.load %arg14[%c0_48, %c0_49] : memref<1x1xf32, #tpu.memory_space<vmem>>, vector<1x1xf32>
    %104 = arith.addf %102, %103 : vector<1x1xf32>
    %c0_50 = arith.constant 0 : index
    %c0_51 = arith.constant 0 : index
    %c0_52 = arith.constant 0 : index
    %105 = vector.load %arg15[%c0_50, %c0_51, %c0_52] : memref<1x1x1xf32, #tpu.memory_space<vmem>>, vector<1x1x1xf32>
    %106 = vector.shape_cast %105 : vector<1x1x1xf32> to vector<1x1xf32>
    %107 = vector.shape_cast %104 : vector<1x1xf32> to vector<1x1x1xf32>
    tpu.vector_store %arg15[%c0_50, %c0_51, %c0_52], %107 {strides = array<i32>} : memref<1x1x1xf32, #tpu.memory_space<vmem>>, vector<1x1x1xf32>,
    return
  }
  func.func @transform_0(%arg0: i32) -> (i32, i32, i32) {
    %c0_i32 = arith.constant 0 : i32
    %c0_i32_0 = arith.constant 0 : i32
    %c0_i32_1 = arith.constant 0 : i32
    return %arg0, %c0_i32, %c0_i32_0 : i32, i32, i32
  }
  func.func @transform_1(%arg0: i32) -> (i32, i32, i32) {
    %c0_i32 = arith.constant 0 : i32
    %c0_i32_0 = arith.constant 0 : i32
    %c0_i32_1 = arith.constant 0 : i32
    return %arg0, %c0_i32, %c0_i32_0 : i32, i32, i32
  }
  func.func @transform_2(%arg0: i32) -> (i32, i32, i32) {
    %c0_i32 = arith.constant 0 : i32
    %c0_i32_0 = arith.constant 0 : i32
    %c0_i32_1 = arith.constant 0 : i32
    return %arg0, %c0_i32, %c0_i32_0 : i32, i32, i32
  }
  func.func @transform_3(%arg0: i32) -> (i32, i32) {
    %c0_i32 = arith.constant 0 : i32
    %c0_i32_0 = arith.constant 0 : i32
    %c0_i32_1 = arith.constant 0 : i32
    return %c0_i32, %c0_i32_0 : i32, i32
  }
  func.func @transform_4(%arg0: i32) -> (i32, i32) {
    %c0_i32 = arith.constant 0 : i32
    %c0_i32_0 = arith.constant 0 : i32
    %c0_i32_1 = arith.constant 0 : i32
    return %c0_i32, %c0_i32_0 : i32, i32
  }
  func.func @transform_5(%arg0: i32) -> (i32, i32) {
    %c0_i32 = arith.constant 0 : i32
    %c0_i32_0 = arith.constant 0 : i32
    %c0_i32_1 = arith.constant 0 : i32
    return %c0_i32, %c0_i32_0 : i32, i32
  }
  func.func @transform_6(%arg0: i32) -> (i32, i32) {
    %c0_i32 = arith.constant 0 : i32
    %c0_i32_0 = arith.constant 0 : i32
    %c0_i32_1 = arith.constant 0 : i32
    return %c0_i32, %c0_i32_0 : i32, i32
  }
  func.func @transform_7(%arg0: i32) -> (i32, i32) {
    %c0_i32 = arith.constant 0 : i32
    %c0_i32_0 = arith.constant 0 : i32
    %c0_i32_1 = arith.constant 0 : i32
    return %c0_i32, %c0_i32_0 : i32, i32
  }
  func.func @transform_8(%arg0: i32) -> (i32, i32) {
    %c0_i32 = arith.constant 0 : i32
    %c0_i32_0 = arith.constant 0 : i32
    %c0_i32_1 = arith.constant 0 : i32
    return %c0_i32, %c0_i32_0 : i32, i32
  }
  func.func @transform_9(%arg0: i32) -> (i32, i32) {
    %c0_i32 = arith.constant 0 : i32
    %c0_i32_0 = arith.constant 0 : i32
    %c0_i32_1 = arith.constant 0 : i32
    return %c0_i32, %c0_i32_0 : i32, i32
  }
  func.func @transform_10(%arg0: i32) -> (i32, i32) {
    %c0_i32 = arith.constant 0 : i32
    %c0_i32_0 = arith.constant 0 : i32
    %c0_i32_1 = arith.constant 0 : i32
    return %c0_i32, %c0_i32_0 : i32, i32
  }
  func.func @transform_11(%arg0: i32) -> (i32, i32) {
    %c0_i32 = arith.constant 0 : i32
    %c0_i32_0 = arith.constant 0 : i32
    %c0_i32_1 = arith.constant 0 : i32
    return %c0_i32, %c0_i32_0 : i32, i32
  }
  func.func @transform_12(%arg0: i32) -> (i32, i32) {
    %c0_i32 = arith.constant 0 : i32
    %c0_i32_0 = arith.constant 0 : i32
    %c0_i32_1 = arith.constant 0 : i32
    return %c0_i32, %c0_i32_0 : i32, i32
  }
  func.func @transform_13(%arg0: i32) -> (i32, i32) {
    %c0_i32 = arith.constant 0 : i32
    %c0_i32_0 = arith.constant 0 : i32
    %c0_i32_1 = arith.constant 0 : i32
    return %c0_i32, %c0_i32_0 : i32, i32
  }
  func.func @transform_14(%arg0: i32) -> (i32, i32, i32) {
    %c0_i32 = arith.constant 0 : i32
    %c0_i32_0 = arith.constant 0 : i32
    %c0_i32_1 = arith.constant 0 : i32
    return %arg0, %c0_i32, %c0_i32_0 : i32, i32, i32
  }
}

</mosaic_0001>

<bundles_post_ra>
// kernel: tpu_custom_call.1
= control target key start
LH: loop header
LB: loop body
LE: loop exit
PB: predicated region body
PF: predicated region fallthrough
CT: control target
= control target key end

     0   :  { %s2999_s0 = inlined_call_operand.hbm [shape: f32[4,16,16], index: 0, kind: input, shape index: {}]   ;;  %s3000_s1 = inlined_call_operand.hbm [shape: bf16[4,16,16], index: 1, kind: input, shape index: {}]   ;;  %s3001_s2 = inlined_call_operand.hbm [shape: f32[4,16,1], index: 2, kind: input, shape index: {}]   ;;  %s3002_s3 = inlined_call_operand.hbm [shape: bf16[32,32], index: 3, kind: input, shape index: {}]   ;;  %s3003_s4 = inlined_call_operand.hbm [shape: f32[1,32], index: 4, kind: input, shape index: {}]   ;;  %s3004_s5 = inlined_call_operand.hbm [shape: bf16[64,32], index: 5, kind: input, shape index: {}]   ;;  %s3005_s6 = inlined_call_operand.hbm [shape: f32[1,32], index: 6, kind: input, shape index: {}]   ;;  %s3006_s7 = inlined_call_operand.hbm [shape: f32[1,32], index: 7, kind: input, shape index: {}]   ;;  %s3007_s8 = inlined_call_operand.hbm [shape: f32[1,32], index: 8, kind: input, shape index: {}]   ;;  %s3008_s9 = inlined_call_operand.hbm [shape: f32[1,32], index: 9, kind: input, shape index: {}]   ;;  %s3009_s10 = inlined_call_operand.hbm [shape: f32[32,16], index: 10, kind: input, shape index: {}]   ;;  %s3010_s11 = inlined_call_operand.hbm [shape: f32[1,16], index: 11, kind: input, shape index: {}]   ;;  %s3011_s12 = inlined_call_operand.hbm [shape: f32[16,1], index: 12, kind: input, shape index: {}]   ;;  %s3012_s13 = inlined_call_operand.<no memory space> [shape: f32[1,1], index: 13, kind: input, shape index: {}]   ;;  %s3013_s14 = inlined_call_operand.hbm [shape: f32[4,1,1], index: 14, kind: output, shape index: {}]  }
   0x1   :  { %3037 = sst [smem:[#allocation38_spill]] %s2999_s0  ;;  %v19_v0 = vstv %s3012_s13 }
   0x2   :  { %3038 = sst [smem:[#allocation39_spill]] %s3000_s1  ;;  %20 = vst [vmem:[#allocation2] sm:$0x1] %v19_v0 }
   0x3   :  { %3039 = sst [smem:[#allocation40_spill]] %s3001_s2 }
   0x4   :  { %3040 = sst [smem:[#allocation41_spill]] %s3002_s3 }
   0x5   :  { %3041 = sst [smem:[#allocation42_spill]] %s3003_s4 }
   0x6   :  { %3042 = sst [smem:[#allocation43_spill]] %s3004_s5 }
   0x7   :  { %3043 = sst [smem:[#allocation44_spill]] %s3006_s7 }
   0x8   :  { %3044 = sst [smem:[#allocation45_spill]] %s3008_s9 }
   0x9   :  { %3045 = sst [smem:[#allocation46_spill]] %s3010_s11 }
   0xa   :  { %3046 = sst [smem:[#allocation47_spill]] %s3011_s12 }
   0xb   :  { %3047 = sst [smem:[#allocation48_spill]] %s3013_s14 }
   0xc   :  { %21 = vsyncpa [#allocation4], 0 }
   0xd   :  { %23 = vsyncpa [#allocation4 + $0x1], 0 }
   0xe   :  { %24 = vsyncpa [#allocation7], 0 }
   0xf   :  { %26 = vsyncpa [#allocation7 + $0x1], 0 }
  0x10   :  { %27 = vsyncpa [#allocation10], 0 }
  0x11   :  { %28 = vsyncpa [#allocation13], 0 }
  0x12   :  { %29 = vsyncpa [#allocation16], 0 }
  0x13   :  { %30 = vsyncpa [#allocation19], 0 }
  0x14   :  { %31 = vsyncpa [#allocation22], 0 }
  0x15   :  { %32 = vsyncpa [#allocation5], 0 }
  0x16   :  { %34 = vsyncpa [#allocation5 + $0x1], 0  ;;  %s2397_s15 = smov 0   ;;  %s2399_s16 = smov 0  }
  0x17   :  { %s2401_s17 = smov 0   ;;  %s2403_s18 = smov 0  }
  0x18 LB: > { %3048 = sst [smem:[#allocation33_spill]] %s2288_s17  ;;  %s2294_s13 = smov [#allocation9]   ;;  %s2292_s18 = sphi %s2403_s18, %s3095_s18   ;;  %s2288_s17 = sphi %s2401_s17, %s3097_s17   ;;  %s2284_s16 = sphi %s2399_s16, %s3099_s16   ;;  %s2280_s15 = sphi %s2397_s15, %s3098_s15  }
  0x19   : > { %s392_s19 = sshll.u32 %s2294_s13, 4  ;;  %s2418_s20 = sadd.s32 4294967295, %s2292_s18   ;;  %s2423_s19 = int_to_ptr.vmem [resolvable:$true] %s392_s19 }
  0x1a   : > { %p1498_p0 = scmp.ge.s32.totalorder %s2292_s18, 1  ;;  %p3020_p1 = scmp.eq.s32.totalorder %s2418_s20, 0 }
  0x1b   : > { %p380_p2 = scmp.lt.s32.totalorder %s2292_s18, 5  ;;  %s2295_s22 = smov [#allocation12]  }
  0x1c   : > { %s416_s23 = sshll.u32 %s2295_s22, 4  ;;  %s2296_s25 = smov [#allocation15]   ;;  %s2437_s23 = int_to_ptr.vmem [resolvable:$true] %s416_s23 }
  0x1d   : > { %p2425_p3 = pnand %p1498_p0, %p380_p2  ;;  %s441_s26 = sshll.u32 %s2296_s25, 4  ;;  %s2439_s26 = int_to_ptr.vmem [resolvable:$true] %s441_s26 }
  0x1e   : > { %s3052_s3 = sld [smem:[#allocation41_spill]] }
  0x1f   : > { %s3049_s21 = scalar_select %p2425_p3, 1, 0 }
  0x20   : > { %p1687_p4 = pneg %p2425_p3 }
  0x21   : > { %3050 = sst [smem:[#allocation34_spill]] %s3049_s21 }
  0x22   : > { %p2433_p5 = pnand %p1687_p4, %p3020_p1 }
  0x24   : > { %s3051_s24 = scalar_select %p2433_p5, 1, 0 }
  0x25   : > { %s1832_s29 = scalar_lea.hbm %s3052_s3, 256  ;;  %p2449_p7 = pneg %p2433_p5 }
  0x26   : > { %p1833_p6 = scmp.ne.s32.totalorder %s3052_s3, %s1832_s29  ;;  %p1839_p10 = scmp.lt.u32.totalorder %s1832_s29, %s3052_s3 }
  0x27   : > { %s3053_s22 = scalar_select %p2449_p7, 1, 0 }
  0x28   : > { %p1835_p8 = pnand %p2449_p7, %p1833_p6 }
  0x2a   : > { %p1836_p9 = pneg %p1835_p8 }
  0x2c   : > { %p1841_p11 = pnand %p1839_p10, %p1836_p9 }
  0x2e   : > { %1844 = shalt.err (!%p1841_p11)
}
  0x2f   : > { %s1845_s27 = scalar_lea.vmem %s2423_s19, 256  ;;  %p1853_p2 = scmp.lt.s32.totalorder %s2423_s19, %s2423_s19 }
  0x30   : > { %p1846_p12 = scmp.ne.s32.totalorder %s2423_s19, %s1845_s27  ;;  %p1854_p4 = scmp.lt.s32.totalorder %s1845_s27, %s1845_s27 }
  0x32   : > { %p1848_p13 = pnand %p1846_p12, %p2449_p7  ;;  %p1855_p6 = por %p1854_p4, %p1853_p2 }
  0x34   : > { %p1849_p0 = pneg %p1848_p13 }
  0x36   : > { %p1856_p8 = pnand %p1855_p6, %p1849_p0 }
  0x38   : > { %1859 = shalt.err (!%p1856_p8)
}
  0x39   : > { %s3019_s28 = smov 64   ;;  %s3022_s14 = smov 4  }
  0x3a   : > { %1690 = dma.hbm_to_vmem [thread:$0]  (!%p2433_p5), %s3052_s3, 256, %s2423_s19, [#allocation10], %s3019_s28, %s3019_s28, %s3022_s14  }
  0x3b   : > { %s3054_s5 = sld [smem:[#allocation43_spill]] }
  0x41   : > { %s1860_s27 = scalar_lea.hbm %s3054_s5, 512 }
  0x42   : > { %p1861_p9 = scmp.ne.s32.totalorder %s3054_s5, %s1860_s27  ;;  %p1867_p12 = scmp.lt.u32.totalorder %s1860_s27, %s3054_s5 }
  0x44   : > { %p1863_p10 = pnand %p1861_p9, %p2449_p7 }
  0x46   : > { %p1864_p11 = pneg %p1863_p10 }
  0x48   : > { %p1869_p13 = pnand %p1867_p12, %p1864_p11 }
  0x4a   : > { %1872 = shalt.err (!%p1869_p13)
}
  0x4b   : > { %s1873_s19 = scalar_lea.vmem %s2437_s23, 512  ;;  %p1881_p6 = scmp.lt.s32.totalorder %s2437_s23, %s2437_s23 }
  0x4c   : > { %p1874_p0 = scmp.ne.s32.totalorder %s2437_s23, %s1873_s19  ;;  %p1882_p8 = scmp.lt.s32.totalorder %s1873_s19, %s1873_s19 }
  0x4e   : > { %p1876_p2 = pnand %p1874_p0, %p2449_p7  ;;  %p1883_p9 = por %p1882_p8, %p1881_p6 }
  0x50   : > { %p1877_p4 = pneg %p1876_p2 }
  0x52   : > { %p1884_p10 = pnand %p1883_p9, %p1877_p4 }
  0x54   : > { %1887 = shalt.err (!%p1884_p10)
}
  0x55   : > { %1696 = dma.hbm_to_vmem [thread:$0]  (!%p2433_p5), %s3054_s5, 512, %s2437_s23, [#allocation13], %s3019_s28, %s3019_s28, %s3022_s14  }
  0x56   : > { %s3055_s7 = sld [smem:[#allocation44_spill]] }
  0x5c   : > { %s1888_s29 = scalar_lea.hbm %s3055_s7, 16 }
  0x5d   : > { %p1889_p11 = scmp.ne.s32.totalorder %s3055_s7, %s1888_s29  ;;  %p1895_p0 = scmp.lt.u32.totalorder %s1888_s29, %s3055_s7 }
  0x5f   : > { %p1891_p12 = pnand %p1889_p11, %p2449_p7 }
  0x61   : > { %p1892_p13 = pneg %p1891_p12 }
  0x63   : > { %p1897_p2 = pnand %p1895_p0, %p1892_p13 }
  0x65   : > { %1900 = shalt.err (!%p1897_p2)
}
  0x66   : > { %s1901_s23 = scalar_lea.vmem %s2439_s26, 16  ;;  %s1908_s19 = scalar_lea.vmem %s2439_s26, 32 }
  0x67   : > { %p1902_p4 = scmp.ne.s32.totalorder %s2439_s26, %s1901_s23  ;;  %p1909_p9 = scmp.lt.s32.totalorder %s2439_s26, %s2439_s26 }
  0x68   : > { %p1910_p10 = scmp.lt.s32.totalorder %s1908_s19, %s1901_s23 }
  0x69   : > { %p1904_p6 = pnand %p1902_p4, %p2449_p7 }
  0x6a   : > { %p1911_p11 = por %p1910_p10, %p1909_p9 }
  0x6b   : > { %p1905_p8 = pneg %p1904_p6 }
  0x6d   : > { %p1912_p12 = pnand %p1911_p11, %p1905_p8 }
  0x6f   : > { %1915 = shalt.err (!%p1912_p12)
}
  0x70   : > { %1702 = dma.hbm_to_vmem [thread:$0]  (!%p2433_p5), %s3055_s7, 16, %s2439_s26, [#allocation16]  }
  0x71   : > { %s2299_s12 = smov [#allocation18]   ;;  %s2300_s29 = smov [#allocation21]  }
  0x72   : > { %s463_s21 = sshll.u32 %s2299_s12, 4  ;;  %s487_s30 = sshll.u32 %s2300_s29, 4  ;;  %s464_s21 = int_to_ptr.vmem [resolvable:$true] %s463_s21  ;;  %s488_s30 = int_to_ptr.vmem [resolvable:$true] %s487_s30 }
  0x73   : > { %s3056_s9 = sld [smem:[#allocation45_spill]] }
  0x79   : > { %s1916_s27 = scalar_lea.hbm %s3056_s9, 16 }
  0x7a   : > { %p1917_p13 = scmp.ne.s32.totalorder %s3056_s9, %s1916_s27  ;;  %p1923_p4 = scmp.lt.u32.totalorder %s1916_s27, %s3056_s9 }
  0x7c   : > { %p1919_p0 = pnand %p1917_p13, %p2449_p7 }
  0x7e   : > { %p1920_p2 = pneg %p1919_p0 }
  0x80   : > { %p1925_p6 = pnand %p1923_p4, %p1920_p2 }
  0x82   : > { %1928 = shalt.err (!%p1925_p6)
}
  0x83   : > { %s1929_s26 = scalar_lea.vmem %s464_s21, 16  ;;  %s1936_s2 = scalar_lea.vmem %s464_s21, 32 }
  0x84   : > { %p1930_p8 = scmp.ne.s32.totalorder %s464_s21, %s1929_s26  ;;  %p1937_p11 = scmp.lt.s32.totalorder %s464_s21, %s464_s21 }
  0x85   : > { %p1938_p12 = scmp.lt.s32.totalorder %s1936_s2, %s1929_s26 }
  0x86   : > { %p1932_p9 = pnand %p1930_p8, %p2449_p7 }
  0x87   : > { %p1939_p1 = por %p1938_p12, %p1937_p11 }
  0x88   : > { %p1933_p10 = pneg %p1932_p9 }
  0x8a   : > { %p1940_p3 = pnand %p1939_p1, %p1933_p10 }
  0x8c   : > { %1943 = shalt.err (!%p1940_p3)
}
  0x8d   : > { %1708 = dma.hbm_to_vmem [thread:$0]  (!%p2433_p5), %s3056_s9, 16, %s464_s21, [#allocation19]  }
  0x8e   : > { %s3057_s11 = sld [smem:[#allocation46_spill]] }
  0x94   : > { %s1944_s25 = scalar_lea.hbm %s3057_s11, 16 }
  0x95   : > { %p1945_p13 = scmp.ne.s32.totalorder %s3057_s11, %s1944_s25  ;;  %p1951_p3 = scmp.lt.u32.totalorder %s1944_s25, %s3057_s11 }
  0x97   : > { %p1947_p0 = pnand %p1945_p13, %p2449_p7 }
  0x99   : > { %p1948_p1 = pneg %p1947_p0 }
  0x9b   : > { %p1953_p2 = pnand %p1951_p3, %p1948_p1 }
  0x9d   : > { %1956 = shalt.err (!%p1953_p2)
}
  0x9e   : > { %s1957_s26 = scalar_lea.vmem %s488_s30, 16  ;;  %s1964_s21 = scalar_lea.vmem %s488_s30, 32 }
  0x9f   : > { %p1958_p4 = scmp.ne.s32.totalorder %s488_s30, %s1957_s26  ;;  %p1965_p9 = scmp.lt.s32.totalorder %s488_s30, %s488_s30 }
  0xa0   : > { %p1966_p10 = scmp.lt.s32.totalorder %s1964_s21, %s1957_s26 }
  0xa1   : > { %p1960_p6 = pnand %p1958_p4, %p2449_p7 }
  0xa2   : > { %p1967_p11 = por %p1966_p10, %p1965_p9 }
  0xa3   : > { %p1961_p8 = pneg %p1960_p6 }
  0xa5   : > { %p1968_p12 = pnand %p1967_p11, %p1961_p8 }
  0xa7   : > { %1971 = shalt.err (!%p1968_p12)
}
  0xa8   : > { %1714 = dma.hbm_to_vmem [thread:$0]  (!%p2433_p5), %s3057_s11, 16, %s488_s30, [#allocation22]  }
  0xa9   : > { %s1497_s29 = sadd.s32 4294967294, %s2292_s18   ;;  %s2561_s28 = sadd.s32 1, %s2292_s18  }
  0xaa   : > { %3058 = sst [smem:[#allocation35_spill]] %s2561_s28  ;;  %s47_s13 = sadd.s32 1, %s2288_s17 }
  0xab   : > { %s44_s25 = ssub.s32 %s2292_s18, %s2561_s28  ;;  %p54_p13 = scmp.ne.s32.totalorder %s2288_s17, %s2284_s16 }
  0xac   : > { %p45_p0 = scmp.eq.s32.totalorder %s44_s25, 0  ;;  %p55_p1 = scmp.eq.s32.totalorder %s2292_s18, 0 }
  0xad   : > { %p60_p3 = scmp.ne.s32.totalorder %s2284_s16, %s2280_s15  ;;  %p367_p2 = scmp.eq.s32.totalorder %s2418_s20, 3 }
  0xae   : > { %s2573_s27 = scalar_select %p45_p0, %s2288_s17, %s47_s13  }
  0xaf   : > { %p56_p4 = por %p55_p1, %p54_p13  ;;  %p3060_p6 = scmp.eq.s32.totalorder %s2418_s20, 0 }
  0xb0   : > { %3059 = sst [smem:[#allocation36_spill]] %s2573_s27  ;;  %p2581_p9 = por %p367_p2, %p54_p13 }
  0xb1   : > { %p2577_p8 = por %p3060_p6, %p60_p3  ;;  %p373_p10 = scmp.eq.s32.totalorder %s1497_s29, 3 }
  0xb2   : > { %s3062_s23 = scalar_select %p2581_p9, 1, 0 }
  0xb3   : > { %s3061_s30 = scalar_select %p2577_p8, 1, 0 }
  0xb4   : > { %p1742_p11 = scmp.lt.s32.totalorder %s2292_s18, 4  ;;  %s2587_s19 = sand.u32 1, %s2288_s17  }
  0xb5   : > { %p2589_p12 = por %p373_p10, %p60_p3  ;;  %s535_s26 = sand.u32 1, %s2292_s18  }
  0xb6   : > { %p2594_p0 = pnand %p1742_p11, %p56_p4  ;;  %s1513_s2 = sshll.u32 %s2587_s19, 3 }
  0xb7   : > { %s3063_s0 = scalar_select %p2589_p12, 1, 0 }
  0xb8   : > { %s3065_s21 = scalar_select %p2594_p0, 1, 0 }
  0xb9   : > { %3064 = sst [smem:[#allocation37_spill]] %s3063_s0  ;;  %s1554_s12 = sshll.u32 %s2292_s18, 7 }
  0xba   : > { %s3066_s1 = sld [smem:[#allocation39_spill]]  ;;  %s539_s14 = scalar_lea.vmem [#allocation6], %s1513_s2 }
  0xbb   : > { %s546_s3 = sshll.u32 %s539_s14, 4  ;;  %s2607_s5 = scalar_lea.sflag [#allocation7], %s535_s26  ;;  %s2605_s3 = int_to_ptr.vmem [resolvable:$true] %s546_s3 }
  0xbc   : > { %p2613_p1 = pneg %p2594_p0 }
  0xbe   : > { %s3067_s9 = scalar_select %p2613_p1, 1, 0 }
  0xc0   : > { %s2603_s29 = scalar_lea.hbm %s3066_s1, %s1554_s12  ;;  %s1977_s2 = scalar_lea.hbm %s3066_s1, 512 }
  0xc1   : > { %s1972_s7 = scalar_lea.hbm %s2603_s29, 128  ;;  %p1978_p4 = scmp.lt.u32.totalorder %s2603_s29, %s3066_s1 }
  0xc2   : > { %p1973_p13 = scmp.ne.s32.totalorder %s2603_s29, %s1972_s7  ;;  %p1979_p6 = scmp.lt.u32.totalorder %s1977_s2, %s1972_s7 }
  0xc3   : > { %p1981_p11 = scmp.lt.u32.totalorder %s1972_s7, %s2603_s29 }
  0xc4   : > { %p1975_p3 = pnand %p2613_p1, %p1973_p13  ;;  %p1980_p10 = por %p1979_p6, %p1978_p4 }
  0xc6   : > { %p1976_p2 = pneg %p1975_p3  ;;  %p1982_p12 = por %p1981_p11, %p1980_p10 }
  0xc8   : > { %p1983_p9 = pnand %p1982_p12, %p1976_p2 }
  0xca   : > { %1986 = shalt.err (!%p1983_p9)
}
  0xcb   : > { %s1987_s26 = scalar_lea.vmem %s2605_s3, 128  ;;  %s2301_s12 = smov [#allocation6]  }
  0xcc   : > { %p1988_p13 = scmp.ne.s32.totalorder %s2605_s3, %s1987_s26  ;;  %s1992_s13 = sshll.u32 %s2301_s12, 4  ;;  %s1993_s13 = int_to_ptr.vmem [resolvable:$false] %s1992_s13 }
  0xcd   : > { %s1994_s14 = scalar_lea.vmem %s1993_s13, 256  ;;  %p1995_p5 = scmp.lt.s32.totalorder %s2605_s3, %s1993_s13 }
  0xce   : > { %p1990_p3 = pnand %p1988_p13, %p2613_p1  ;;  %p1996_p7 = scmp.lt.s32.totalorder %s1994_s14, %s1987_s26 }
  0xd0   : > { %p1991_p8 = pneg %p1990_p3  ;;  %p1997_p4 = por %p1996_p7, %p1995_p5 }
  0xd2   : > { %p1998_p6 = pnand %p1997_p4, %p1991_p8 }
  0xd4   : > { %2001 = shalt.err (!%p1998_p6)
}
  0xd5   : > { %s3068_s7 = smov 4   ;;  %s3069_s2 = smov 64  }
  0xd6   : > { %1724 = dma.hbm_to_vmem [thread:$0]  (!%p2594_p0), %s2603_s29, 128, %s2605_s3, %s2607_s5, %s3069_s2, %s3069_s2, %s3068_s7  }
  0xd7   : > { %s2302_s25 = smov [#allocation11]   ;;  %s2303_s12 = smov [#allocation14]  }
  0xd8   : > { %s406_s1 = sshll.u32 %s2302_s25, 4  ;;  %s430_s11 = sshll.u32 %s2303_s12, 4  ;;  %s407_s1 = int_to_ptr.vmem [resolvable:$true] %s406_s1  ;;  %s431_s11 = int_to_ptr.vmem [resolvable:$true] %s430_s11 }
  0xd9   : > { %s3070_s4 = sld [smem:[#allocation42_spill]]  ;;  %p3071_p7 = scmp.ne.s32.totalorder %s3053_s22, 0 }
  0xdf   : > { %s2002_s14 = scalar_lea.hbm %s3070_s4, 16 }
  0xe0   : > { %p2003_p5 = scmp.ne.s32.totalorder %s3070_s4, %s2002_s14  ;;  %p2009_p12 = scmp.lt.u32.totalorder %s2002_s14, %s3070_s4 }
  0xe2   : > { %p2005_p8 = pnand %p2003_p5, %p3071_p7 }
  0xe4   : > { %p2006_p9 = pneg %p2005_p8 }
  0xe6   : > { %p2011_p2 = pnand %p2009_p12, %p2006_p9 }
  0xe8   : > { %2014 = shalt.err (!%p2011_p2)
}
  0xe9   : > { %s2015_s3 = scalar_lea.vmem %s407_s1, 16  ;;  %s2022_s29 = scalar_lea.vmem %s407_s1, 32 }
  0xea   : > { %p2016_p10 = scmp.ne.s32.totalorder %s407_s1, %s2015_s3  ;;  %p2023_p3 = scmp.lt.s32.totalorder %s407_s1, %s407_s1 }
  0xeb   : > { %p2024_p4 = scmp.lt.s32.totalorder %s2022_s29, %s2015_s3 }
  0xec   : > { %p2018_p11 = pnand %p2016_p10, %p3071_p7 }
  0xed   : > { %p2025_p6 = por %p2024_p4, %p2023_p3 }
  0xee   : > { %p2019_p13 = pneg %p2018_p11 }
  0xf0   : > { %p2026_p0 = pnand %p2025_p6, %p2019_p13 }
  0xf2   : > { %2029 = shalt.err (!%p2026_p0)
}
  0xf3   : > { %p3072_p5 = scmp.ne.s32.totalorder %s3051_s24, 0  ;;  %s2030_s7 = scalar_lea.hbm %s3005_s6, 16 }
  0xf4   : > { %p2031_p8 = scmp.ne.s32.totalorder %s3005_s6, %s2030_s7  ;;  %p2037_p0 = scmp.lt.u32.totalorder %s2030_s7, %s3005_s6 }
  0xf5   : > { %1693 = dma.hbm_to_vmem [thread:$0]  (!%p3072_p5), %s3070_s4, 16, %s407_s1, [#allocation10]  }
  0xf6   : > { %p2033_p9 = pnand %p2031_p8, %p3071_p7 }
  0xf8   : > { %p2034_p12 = pneg %p2033_p9 }
  0xfa   : > { %p2039_p2 = pnand %p2037_p0, %p2034_p12 }
  0xfc   : > { %2042 = shalt.err (!%p2039_p2)
}
  0xfd   : > { %s2043_s26 = scalar_lea.vmem %s431_s11, 16  ;;  %s2050_s1 = scalar_lea.vmem %s431_s11, 32 }
  0xfe   : > { %p2044_p10 = scmp.ne.s32.totalorder %s431_s11, %s2043_s26  ;;  %p2051_p3 = scmp.lt.s32.totalorder %s431_s11, %s431_s11 }
  0xff   : > { %p2052_p4 = scmp.lt.s32.totalorder %s2050_s1, %s2043_s26 }
 0x100   : > { %p2046_p11 = pnand %p2044_p10, %p3071_p7 }
 0x101   : > { %p2053_p6 = por %p2052_p4, %p2051_p3 }
 0x102   : > { %p2047_p13 = pneg %p2046_p11 }
 0x104   : > { %p2054_p1 = pnand %p2053_p6, %p2047_p13 }
 0x106   : > { %2057 = shalt.err (!%p2054_p1)
}
 0x107   : > { %1699 = dma.hbm_to_vmem [thread:$0]  (!%p3072_p5), %s3005_s6, 16, %s431_s11, [#allocation13]  }
 0x108   : > { %s2304_s29 = smov [#allocation17]   ;;  %s2305_s27 = smov [#allocation20]  }
 0x109   : > { %s452_s17 = sshll.u32 %s2304_s29, 4  ;;  %s473_s28 = sshll.u32 %s2305_s27, 4  ;;  %s453_s17 = int_to_ptr.vmem [resolvable:$true] %s452_s17  ;;  %s474_s28 = int_to_ptr.vmem [resolvable:$true] %s473_s28 }
 0x10a   : > { %s2058_s2 = scalar_lea.hbm %s3007_s8, 16 }
 0x10b   : > { %p2059_p1 = scmp.ne.s32.totalorder %s3007_s8, %s2058_s2  ;;  %p2065_p12 = scmp.lt.u32.totalorder %s2058_s2, %s3007_s8 }
 0x10d   : > { %p2061_p8 = pnand %p2059_p1, %p3071_p7 }
 0x10f   : > { %p2062_p9 = pneg %p2061_p8 }
 0x111   : > { %p2067_p0 = pnand %p2065_p12, %p2062_p9 }
 0x113   : > { %2070 = shalt.err (!%p2067_p0)
}
 0x114   : > { %s2071_s11 = scalar_lea.vmem %s453_s17, 16  ;;  %s2078_s1 = scalar_lea.vmem %s453_s17, 32 }
 0x115   : > { %p2072_p2 = scmp.ne.s32.totalorder %s453_s17, %s2071_s11  ;;  %p2079_p13 = scmp.lt.s32.totalorder %s453_s17, %s453_s17 }
 0x116   : > { %p2080_p3 = scmp.lt.s32.totalorder %s2078_s1, %s2071_s11 }
 0x117   : > { %p2074_p10 = pnand %p2072_p2, %p3071_p7 }
 0x118   : > { %p2081_p4 = por %p2080_p3, %p2079_p13 }
 0x119   : > { %p2075_p11 = pneg %p2074_p10 }
 0x11b   : > { %p2082_p6 = pnand %p2081_p4, %p2075_p11 }
 0x11d   : > { %2085 = shalt.err (!%p2082_p6)
}
 0x11e   : > { %1705 = dma.hbm_to_vmem [thread:$0]  (!%p3072_p5), %s3007_s8, 16, %s453_s17, [#allocation16]  }
 0x11f   : > { %s2086_s0 = scalar_lea.hbm %s3009_s10, 512 }
 0x120   : > { %p2087_p1 = scmp.ne.s32.totalorder %s3009_s10, %s2086_s0  ;;  %p2093_p12 = scmp.lt.u32.totalorder %s2086_s0, %s3009_s10 }
 0x122   : > { %p2089_p8 = pnand %p2087_p1, %p3071_p7 }
 0x124   : > { %p2090_p9 = pneg %p2089_p8 }
 0x126   : > { %p2095_p0 = pnand %p2093_p12, %p2090_p9 }
 0x128   : > { %2098 = shalt.err (!%p2095_p0)
}
 0x129   : > { %s2099_s13 = scalar_lea.vmem %s474_s28, 512  ;;  %p2107_p13 = scmp.lt.s32.totalorder %s474_s28, %s474_s28 }
 0x12a   : > { %p2100_p2 = scmp.ne.s32.totalorder %s474_s28, %s2099_s13  ;;  %p2108_p3 = scmp.lt.s32.totalorder %s2099_s13, %s2099_s13 }
 0x12c   : > { %p2102_p10 = pnand %p2100_p2, %p3071_p7  ;;  %p2109_p4 = por %p2108_p3, %p2107_p13 }
 0x12e   : > { %p2103_p11 = pneg %p2102_p10 }
 0x130   : > { %p2110_p6 = pnand %p2109_p4, %p2103_p11 }
 0x132   : > { %2113 = shalt.err (!%p2110_p6)
}
 0x133   : > { %s2306_s17 = smov 128   ;;  %s2307_s26 = smov 8  }
 0x134   : > { %1711 = dma.hbm_to_vmem [thread:$0]  (!%p3072_p5), %s3009_s10, 512, %s474_s28, [#allocation19], %s2306_s17, %s2306_s17, %s2307_s26  }
 0x135   : > { %s2308_s14 = smov [#allocation23]   ;;  %s1510_s29 = sshll.u32 %s2587_s19, 4 }
 0x136   : > { %s497_s3 = sshll.u32 %s2308_s14, 4  ;;  %s3073_s7 = sld [smem:[#allocation47_spill]]  ;;  %s498_s3 = int_to_ptr.vmem [resolvable:$true] %s497_s3 }
 0x13c   : > { %s2114_s2 = scalar_lea.hbm %s3073_s7, 256 }
 0x13d   : > { %p2115_p1 = scmp.ne.s32.totalorder %s3073_s7, %s2114_s2  ;;  %p2121_p12 = scmp.lt.u32.totalorder %s2114_s2, %s3073_s7 }
 0x13f   : > { %p2117_p8 = pnand %p2115_p1, %p3071_p7 }
 0x141   : > { %p2118_p9 = pneg %p2117_p8 }
 0x143   : > { %p2123_p0 = pnand %p2121_p12, %p2118_p9 }
 0x145   : > { %2126 = shalt.err (!%p2123_p0)
}
 0x146   : > { %s2127_s28 = scalar_lea.vmem %s498_s3, 256  ;;  %p2135_p13 = scmp.lt.s32.totalorder %s498_s3, %s498_s3 }
 0x147   : > { %p2128_p2 = scmp.ne.s32.totalorder %s498_s3, %s2127_s28  ;;  %p2136_p3 = scmp.lt.s32.totalorder %s2127_s28, %s2127_s28 }
 0x149   : > { %p2130_p10 = pnand %p2128_p2, %p3071_p7  ;;  %p2137_p4 = por %p2136_p3, %p2135_p13 }
 0x14b   : > { %p2131_p11 = pneg %p2130_p10 }
 0x14d   : > { %p2138_p6 = pnand %p2137_p4, %p2131_p11 }
 0x14f   : > { %2141 = shalt.err (!%p2138_p6)
}
 0x150   : > { %1717 = dma.hbm_to_vmem [thread:$0]  (!%p3072_p5), %s3073_s7, 256, %s498_s3, [#allocation22], %s2306_s17, %s2306_s17, %s2307_s26  }
 0x151   : > { %s1553_s22 = sshll.u32 %s2292_s18, 8  ;;  %s3074_s27 = sld [smem:[#allocation38_spill]] }
 0x152   : > { %s518_s24 = scalar_lea.vmem [#allocation3], %s1510_s29  ;;  %s515_s25 = scalar_lea.sflag [#allocation4], %s2587_s19 }
 0x153   : > { %s525_s2 = sshll.u32 %s518_s24, 4  ;;  %p3075_p5 = scmp.ne.s32.totalorder %s3067_s9, 0  ;;  %s2747_s2 = int_to_ptr.vmem [resolvable:$true] %s525_s2 }
 0x157   : > { %s2743_s0 = scalar_lea.hbm %s3074_s27, %s1553_s22  ;;  %s2147_s28 = scalar_lea.hbm %s3074_s27, 1024 }
 0x158   : > { %s2142_s12 = scalar_lea.hbm %s2743_s0, 256  ;;  %p2148_p9 = scmp.lt.u32.totalorder %s2743_s0, %s3074_s27 }
 0x159   : > { %p2143_p7 = scmp.ne.s32.totalorder %s2743_s0, %s2142_s12  ;;  %p2149_p12 = scmp.lt.u32.totalorder %s2147_s28, %s2142_s12 }
 0x15a   : > { %p2151_p2 = scmp.lt.u32.totalorder %s2142_s12, %s2743_s0 }
 0x15b   : > { %p2145_p1 = pnand %p2143_p7, %p3075_p5  ;;  %p2150_p0 = por %p2149_p12, %p2148_p9 }
 0x15d   : > { %p2146_p8 = pneg %p2145_p1  ;;  %p2152_p10 = por %p2151_p2, %p2150_p0 }
 0x15f   : > { %p2153_p11 = pnand %p2152_p10, %p2146_p8 }
 0x161   : > { %2156 = shalt.err (!%p2153_p11)
}
 0x162   : > { %s2157_s1 = scalar_lea.vmem %s2747_s2, 256  ;;  %s2309_s14 = smov [#allocation3]  }
 0x163   : > { %p2158_p13 = scmp.ne.s32.totalorder %s2747_s2, %s2157_s1  ;;  %s2162_s24 = sshll.u32 %s2309_s14, 4  ;;  %s2163_s24 = int_to_ptr.vmem [resolvable:$false] %s2162_s24 }
 0x164   : > { %s2164_s3 = scalar_lea.vmem %s2163_s24, 512  ;;  %p2165_p6 = scmp.lt.s32.totalorder %s2747_s2, %s2163_s24 }
 0x165   : > { %p2160_p3 = pnand %p2158_p13, %p3075_p5  ;;  %p2166_p7 = scmp.lt.s32.totalorder %s2164_s3, %s2157_s1 }
 0x167   : > { %p2161_p4 = pneg %p2160_p3  ;;  %p2167_p1 = por %p2166_p7, %p2165_p6 }
 0x169   : > { %p2168_p9 = pnand %p2167_p1, %p2161_p4 }
 0x16b   : > { %2171 = shalt.err (!%p2168_p9)
}
 0x16c   : > { %p3076_p8 = scmp.ne.s32.totalorder %s3065_s21, 0  ;;  %s3077_s28 = sld [smem:[#allocation40_spill]] }
 0x16d   : > { %s560_s11 = scalar_lea.vmem [#allocation8], %s1510_s29 }
 0x16e   : > { %1721 = dma.hbm_to_vmem [thread:$0]  (!%p3076_p8), %s2743_s0, 256, %s2747_s2, %s515_s25, %s2306_s17, %s2306_s17, %s2307_s26  }
 0x16f   : > { %s567_s1 = sshll.u32 %s560_s11, 4  ;;  %s2785_s1 = int_to_ptr.vmem [resolvable:$true] %s567_s1 }
 0x172   : > { %s2781_s4 = scalar_lea.hbm %s3077_s28, %s1553_s22  ;;  %s2177_s25 = scalar_lea.hbm %s3077_s28, 1024 }
 0x173   : > { %s2172_s14 = scalar_lea.hbm %s2781_s4, 256  ;;  %p2178_p10 = scmp.lt.u32.totalorder %s2781_s4, %s3077_s28 }
 0x174   : > { %p2173_p12 = scmp.ne.s32.totalorder %s2781_s4, %s2172_s14  ;;  %p2179_p11 = scmp.lt.u32.totalorder %s2177_s25, %s2172_s14 }
 0x175   : > { %p2181_p3 = scmp.lt.u32.totalorder %s2172_s14, %s2781_s4 }
 0x176   : > { %p2175_p0 = pnand %p2173_p12, %p3075_p5  ;;  %p2180_p13 = por %p2179_p11, %p2178_p10 }
 0x178   : > { %p2176_p2 = pneg %p2175_p0  ;;  %p2182_p4 = por %p2181_p3, %p2180_p13 }
 0x17a   : > { %p2183_p6 = pnand %p2182_p4, %p2176_p2 }
 0x17c   : > { %2186 = shalt.err (!%p2183_p6)
}
 0x17d   : > { %s2187_s19 = scalar_lea.vmem %s2785_s1, 256  ;;  %s2310_s29 = smov [#allocation8]  }
 0x17e   : > { %p2188_p7 = scmp.ne.s32.totalorder %s2785_s1, %s2187_s19  ;;  %s2192_s3 = sshll.u32 %s2310_s29, 4  ;;  %s2193_s3 = int_to_ptr.vmem [resolvable:$false] %s2192_s3 }
 0x17f   : > { %s2194_s12 = scalar_lea.vmem %s2193_s3, 512  ;;  %p2195_p12 = scmp.lt.s32.totalorder %s2785_s1, %s2193_s3 }
 0x180   : > { %p2190_p1 = pnand %p2188_p7, %p3075_p5  ;;  %p2196_p0 = scmp.lt.s32.totalorder %s2194_s12, %s2187_s19 }
 0x182   : > { %p2191_p9 = pneg %p2190_p1  ;;  %p2197_p10 = por %p2196_p0, %p2195_p12 }
 0x184   : > { %p2198_p11 = pnand %p2197_p10, %p2191_p9 }
 0x186   : > { %2201 = shalt.err (!%p2198_p11)
}
 0x187   : > { %1727 = dma.hbm_to_vmem [thread:$0]  (!%p3076_p8), %s2781_s4, 256, %s2785_s1, %s2607_s5, %s2306_s17, %s2306_s17, %s2307_s26  }
 0x188   : > { %s3078_s9 = sld [smem:[#allocation34_spill]] }
 0x18e   : > { %p3079_p5 = scmp.ne.s32.totalorder %s3078_s9, 0 }
 0x18f   : > { %s2815_s13 = sand.u32 (!%p3079_p5), 1, %s2284_s16   ;;  %p3080_p2 = scmp.ne.s32.totalorder (!%p3079_p5), %s3061_s30, 0 }
 0x190   : > { %579 = sbr.rel (%p3079_p5) target bundleno = 1893 (0x765), region = 76  ;;  %s1520_s11 = sshll.u32 (!%p3079_p5), %s2815_s13, 4 }
 0x191   : > { %s582_s14 = scalar_lea.sflag (!%p3079_p5), [#allocation4], %s2815_s13  ;;  %s585_s0 = scalar_lea.vmem (!%p3079_p5), [#allocation3], %s1520_s11 }
 0x197   : > { %2247 = dma.done.wait (%p3080_p2), %s582_s14, 256  }
 0x198   : > { %2249 = vsyncadd (%p3080_p2), %s582_s14, 4294967040  ;;  %s590_s5 = sand.u32 1, %s2418_s20   ;;  %s1521_s21 = sshll.u32 %s2815_s13, 3 }
 0x199   : > { %s591_s17 = scalar_lea.sflag [#allocation7], %s590_s5  ;;  %s594_s26 = scalar_lea.vmem [#allocation6], %s1521_s21 }
 0x19a   : > { %2251 = dma.done.wait (%p3080_p2), %s591_s17, 384  }
 0x19b   : > { %2253 = vsyncadd (%p3080_p2), %s591_s17, 4294966912  ;;  %s2829_s4 = scalar_lea.vmem [#allocation8], %s1520_s11  ;;  %p3081_p8 = scmp.eq.s32.totalorder %s2418_s20, 0 }
 0x19d   : > { %2255 = dma.done.wait (%p3081_p8), [#allocation10], 272   ;;  %p3082_p13 = pmov %p3081_p8 }
 0x19e   : > { %p3083_p3 = pmov %p3081_p8 }
 0x19f   : > { %2257 = vsyncadd (%p3082_p13), [#allocation10], 4294967024 }
 0x1a0   : > { %2259 = dma.done.wait (%p3083_p3), [#allocation13], 528   ;;  %p3084_p4 = pmov %p3083_p3 }
 0x1a1   : > { %p3085_p6 = pmov %p3083_p3 }
 0x1a2   : > { %2261 = vsyncadd (%p3084_p4), [#allocation13], 4294966768 }
 0x1a3   : > { %2263 = dma.done.wait (%p3085_p6), [#allocation16], 32   ;;  %p3086_p7 = pmov %p3083_p3 }
 0x1a4   : > { %p3087_p1 = pmov %p3083_p3 }
 0x1a5   : > { %2265 = vsyncadd (%p3086_p7), [#allocation16], 4294967264 }
 0x1a6   : > { %2267 = dma.done.wait (%p3087_p1), [#allocation19], 528   ;;  %p3088_p9 = pmov %p3087_p1 }
 0x1a7   : > { %p3089_p12 = pmov %p3087_p1 }
 0x1a8   : > { %2269 = vsyncadd (%p3088_p9), [#allocation19], 4294966768 }
 0x1a9   : > { %2271 = dma.done.wait (%p3089_p12), [#allocation22], 272   ;;  %p3090_p0 = pmov %p3087_p1 }
 0x1aa   : > { %v2311_v1 = vmov 0.0   ;;  %vm2312_vm0 = vmmov 0   ;;  %v698_v2 = vld [vmem:[%s585_s0] sm:$0xff]  ;;  %v699_v3 = vld [vmem:[%s585_s0 + $0x8] sm:$0xff]  ;;  %vm735_vm1 = vcmask 130048   ;;  %s2313_s30 = smov 16   ;;  %v880_v53 = vlaneseq }
 0x1ab   : > { %2273 = vsyncadd (%p3090_p0), [#allocation22], 4294967024  ;;  %1576 = vmatprep.subr.bf16.mxu0 %v2311_v1  ;;  %1578 = vmatprep.mubr.msk.bf16.mxu0 %vm2312_vm0, %v2311_v1  ;;  %v729_v4 = vpack.c.bf16 %v699_v3, %v698_v2  ;;  %v1807_v5 = vpack.i.bf16 %v699_v3, %v698_v2  ;;  %v2857_v6 = vld [vmem:[%s594_s26] sm:$0xff]   ;;  %v1820_v7 = vld [vmem:[#allocation9] sm:$0xff]   ;;  %vm707_vm2 = vcmask 7168   ;;  %v2314_v14 = vmov 0  }
 0x1ac   : > { %1582 = vmatprep.subr.bf16.mxu1 %v2311_v1  ;;  %1586 = vmatprep.mubr.msk.bf16.mxu1 %vm2312_vm0, %v2311_v1  ;;  %v2866_v8 = vld [vmem:[%s2829_s4] sm:$0xff]  ;;  %v2869_v9 = vld [vmem:[%s2829_s4 + $0x8] sm:$0xff]  ;;  %vm809_vm3 = vcmask 261120   ;;  %s2315_s2 = smov 1.0   ;;  %v2891_v56 = vshrl.u32 %v880_v53, 7  ;;  %s2316_s24 = smov 32  }
 0x1ad   : > { %1577 = vmatpush3.bf16.msra.mxu0 %v729_v4  ;;  %1808 = vrot.lane.b32.xlu0 %v1807_v5, %s2313_s30  ;;  %v708_v10 = vsel %vm707_vm2, %v2866_v8, 0.0  ;;  %v709_v11 = vsel %vm707_vm2, %v2869_v9, 0.0  ;;  %v1821_v13 = vld [vmem:[#allocation9 + $0x8] sm:$0xff]   ;;  %v1535_v34 = vld [vmem:[#allocation11] ss:$0 sm:$0xff]  ;;  %vm1100_vm4 = vcmp.gt.f32.partialorder %v2866_v8, 0.5 }
 0x1ae   : > { %1590 = vmatprep.subr.bf16.mxu0 %v2311_v1  ;;  %1583 = vmatpush3.bf16.msra.mxu1 %v1820_v7  ;;  %v710_v12 = vadd.f32 %v709_v11, %v708_v10  ;;  %v2893_v58 = vld [vmem:[#allocation18] sm:$0x1]  ;;  %v882_v61 = vsub.s32 0, %v2891_v56  ;;  %vm1101_vm5 = vcmp.gt.f32.partialorder %v2869_v9, 0.5  ;;  %vm1012_vm6 = vcmask 523264   ;;  %s1550_s19 = sshll.u32 %s2418_s20, 4 }
 0x1af   : > { %1584 = vmatprep.subr.bf16.mxu1 %v2311_v1  ;;  %1812 = vset.pattern.permute.xlu1 %v2314_v14  ;;  %s696_s29 = scalar_lea.vmem [#allocation24], %s2815_s13  ;;  %vm1278_vm9 = vcmask 0   ;;  %s3091_s11 = sld [smem:[#allocation48_spill]] }
 0x1b0   : > { %1579 = vmatmul.mubr.msk.bf16.vlgmr.msra.gmra.mrb[0].mxu0 %vm735_vm1, %v2857_v6  ;;  %1818 = vset.pattern.permute.xlu0 %v2314_v14  ;;  %s1293_s3 = sshll.u32 %s696_s29, 4  ;;  %s1281_s0 = scalar_lea.sflag [#allocation5], %s2815_s13  ;;  %s2958_s3 = int_to_ptr.vmem [resolvable:$true] %s1293_s3 }
 0x1b1   : > { %1592 = vmatprep.mubr.msk.bf16.mxu0 %vm2312_vm0, %v2311_v1  ;;  %858 = vperm.xlu1 %1812, %v2866_v8   ;;  %v1823_v8 = vld [vmem:[#allocation12 + $0x8] sm:$0xff]   ;;  %s2202_s5 = scalar_lea.vmem %s2958_s3, 16  ;;  %p3092_p11 = scmp.ne.s32.totalorder %s3062_s23, 0 }
 0x1b2   : > { %1585 = vmatpush3.bf16.msra.mxu1 %v1821_v13  ;;  %p2203_p10 = scmp.ne.s32.totalorder %s2958_s3, %s2202_s5  ;;  %s2318_s20 = smov [#allocation24]  }
 0x1b3   : > { %1596 = vmatprep.subr.bf16.mxu1 %v2311_v1  ;;  %s2206_s21 = sshll.u32 %s2318_s20, 4  ;;  %s2207_s21 = int_to_ptr.vmem [resolvable:$false] %s2206_s21 }
 0x1b4   : > { %p2204_p5 = pnand %p2203_p10, %p3092_p11  ;;  %s2208_s17 = scalar_lea.vmem %s2207_s21, 32 }
 0x1b5   : > { %863 = vperm.xlu1 %1812, %v2869_v9   ;;  %s2956_s14 = scalar_lea.hbm %s3091_s11, %s1550_s19  ;;  %p2209_p8 = scmp.lt.s32.totalorder %s2958_s3, %s2207_s21 }
 0x1b6   : > { %p2205_p2 = pneg %p2204_p5  ;;  %p2210_p13 = scmp.lt.s32.totalorder %s2208_s17, %s2202_s5 }
 0x1b8   : > { %p2211_p3 = por %p2210_p13, %p2209_p8 }
 0x1ba   : > { %p2212_p4 = pnand %p2211_p3, %p2205_p2 }
 0x1cc   : > { %711 = vadd.xlane.f32.xlu0 %v710_v12 }
 0x21f   : > { %v1809_v15 = vpop.permute.xlu0 %1808 }
 0x220   : > { %v1811_v23 = vunpack.i.h.bf16 %v1809_v15  ;;  %v1810_v24 = vunpack.i.l.bf16 %v1809_v15 }
 0x230   : > { %v2883_v35 = vpop.permute.xlu1 %858 }
 0x234   : > { %v2886_v45 = vpop.permute.xlu1 %863 }
 0x259   : > { %v712_v16 = vpop.xlane.xlu0 %711 }
 0x25a   : > { %v713_v17 = vrot.slane %v712_v16, 4 }
 0x25c   : > { %v714_v18 = vadd.f32 %v713_v17, %v712_v16 }
 0x25e   : > { %v715_v19 = vrot.slane %v714_v18, 2 }
 0x260   : > { %v716_v20 = vadd.f32 %v715_v19, %v714_v18 }
 0x262   : > { %v717_v21 = vrot.slane %v716_v20, 1 }
 0x264   : > { %v718_v22 = vadd.f32 %v717_v21, %v716_v20 }
 0x266   : > { %1635 = vpush %v718_v22  ;;  %v2907_v22 = vld [vmem:[#allocation15] ss:$0 sm:$0xff] }
 0x283   : > { %v773_v25 = vpop.f32.mrb[0].mxu0 }
 0x284   : > { %v1580_v26 = vpop.f32.mrb[1].mxu0  ;;  %v788_v28 = vsel %vm735_vm1, %v773_v25, %v1810_v24 }
 0x285   : > { %v776_v27 = vpop.f32.mrb[2].mxu0  ;;  %v2911_v26 = vld [vmem:[#allocation17] ss:$0 sm:$0xff] }
 0x286   : > { %v789_v29 = vsel %vm735_vm1, %v776_v27, %v1811_v23  ;;  %v1581_v30 = vpop.f32.mrb[3].mxu0 }
 0x287   : > { %v790_v31 = vpack.c.bf16 %v789_v29, %v788_v28 }
 0x289   : > { %1587 = vmatmul.mubr.msk.bf16.vlgmr.msra.gmra.mrb[0].mxu1 %vm809_vm3, %v790_v31 }
 0x28a   : > { %1604 = vmatprep.mubr.msk.bf16.mxu1 %vm2312_vm0, %v2311_v1 }
 0x297   : > { %s1636_s1 = spop %1635 }
 0x298   : > { %s720_s25 = smax.f32 %s2315_s2, %s1636_s1 }
 0x299   : > { %v721_v32 = vstv %s720_s25 }
 0x29a   : > { %1826 = vrcp.f32 %v721_v32 }
 0x2a4   : > { %v1827_v33 = vpop.eup %1826 }
 0x2a5   : > { %1637 = vpush %v1827_v33  ;;  %v1102_v33 = vsel %vm1100_vm4, 1, %v2314_v14 }
 0x2d6   : > { %s1638_s22 = spop %1637 }
 0x2d7   : > { %v2895_v59 = vstv %s1638_s22 }
 0x35c   : > { %v847_v36 = vpop.f32.mrb[0].mxu1 }
 0x35d   : > { %v848_v37 = vadd.f32 %v1535_v34, %v847_v36  ;;  %v1588_v38 = vpop.f32.mrb[1].mxu1  ;;  %v1822_v36 = vld [vmem:[#allocation12] sm:$0xff]  }
 0x35e   : > { %v850_v39 = vpop.f32.mrb[2].mxu1  ;;  %1597 = vmatpush3.bf16.msra.mxu1 %v1822_v36 }
 0x35f   : > { %v854_v40 = vmax.f32 %v848_v37, 0.0  ;;  %v851_v41 = vadd.f32 %v1535_v34, %v850_v39  ;;  %v1589_v42 = vpop.f32.mrb[3].mxu1  ;;  %v1103_v34 = vsel %vm1101_vm5, 1, %v2314_v14  ;;  %1598 = vmatprep.subr.bf16.mxu1 %v2311_v1  ;;  %v1824_v37 = vld [vmem:[#allocation12 + $0x10] sm:$0xff]  }
 0x361   : > { %v866_v43 = vmul.f32 %v2883_v35, %v854_v40  ;;  %v855_v44 = vmax.f32 %v851_v41, 0.0 }
 0x362   : > { %1599 = vmatpush3.bf16.msra.mxu1 %v1823_v8 }
 0x363   : > { %v867_v46 = vmul.f32 %v2886_v45, %v855_v44  ;;  %v868_v47 = vsel %vm809_vm3, %v866_v43, 0.0  ;;  %1600 = vmatprep.subr.bf16.mxu1 %v2311_v1 }
 0x365   : > { %v869_v48 = vsel %vm809_vm3, %v867_v46, 0.0 }
 0x366   : > { %v870_v49 = vadd.f32 %v869_v48, %v868_v47  ;;  %1601 = vmatpush3.bf16.msra.mxu1 %v1824_v37  ;;  %v1123_v47 = vld [vmem:[#allocation20] sm:$0xff]  ;;  %v1124_v48 = vld [vmem:[#allocation20 + $0x8] sm:$0xff] }
 0x367   : > { %1602 = vmatprep.subr.bf16.mxu1 %v2311_v1 }
 0x368   : > { %v871_v50 = vrot.slane %v870_v49, 4 }
 0x36a   : > { %v872_v51 = vadd.f32 %v871_v50, %v870_v49  ;;  %v1125_v49 = vld [vmem:[#allocation20 + $0x10] sm:$0xff]  ;;  %v2317_v50 = vmov 0.0|0.0  }
 0x36c   : > { %v873_v52 = vrot.slane %v872_v51, 2 }
 0x36e   : > { %v874_v54 = vadd.f32 %v873_v52, %v872_v51  ;;  %v1627_v51 = vpack.c.bf16 %v1124_v48, %v1123_v47  ;;  %v1126_v52 = vld [vmem:[#allocation20 + $0x18] sm:$0xff] }
 0x36f   : > { %v1630_v53 = vpack.c.bf16 %v1126_v52, %v1125_v49  ;;  %v1203_v52 = vld [vmem:[#allocation23 + $0x8] sm:$0xff] }
 0x370   : > { %v875_v55 = vrot.slane %v874_v54, 1 }
 0x372   : > { %v876_v57 = vadd.f32 %v875_v55, %v874_v54  ;;  %v1542_v54 = vld [vmem:[#allocation14] ss:$0 sm:$0xff] }
 0x374   : > { %v878_v60 = vmul.f32 %v2895_v59, %v876_v57 }
 0x376   : > { %v879_v62 = vmul.f32 %v878_v60, %v2893_v58 }
 0x378   : > { %v883_v63 = vrot.slane %v879_v62, %v882_v61 }
 0x37a   : > { %v884_v0 = vsub.f32 %v854_v40, %v883_v63  ;;  %v885_v2 = vsub.f32 %v855_v44, %v883_v63 }
 0x37c   : > { %v886_v3 = vmul.f32 %v884_v0, %v884_v0  ;;  %v887_v4 = vmul.f32 %v885_v2, %v885_v2  ;;  %v906_v23 = vmul.f32 %v2907_v22, %v884_v0  ;;  %v907_v24 = vmul.f32 %v2907_v22, %v885_v2 }
 0x37e   : > { %v888_v5 = vmul.f32 %v886_v3, %v2883_v35  ;;  %v889_v7 = vmul.f32 %v887_v4, %v2886_v45 }
 0x380   : > { %v890_v10 = vsel %vm809_vm3, %v888_v5, 0.0  ;;  %v891_v11 = vsel %vm809_vm3, %v889_v7, 0.0 }
 0x381   : > { %v892_v12 = vadd.f32 %v891_v11, %v890_v10 }
 0x383   : > { %v893_v13 = vrot.slane %v892_v12, 4 }
 0x385   : > { %v894_v15 = vadd.f32 %v893_v13, %v892_v12 }
 0x387   : > { %v895_v16 = vrot.slane %v894_v15, 2 }
 0x389   : > { %v896_v17 = vadd.f32 %v895_v16, %v894_v15 }
 0x38b   : > { %v897_v18 = vrot.slane %v896_v17, 1 }
 0x38d   : > { %v898_v19 = vadd.f32 %v897_v18, %v896_v17 }
 0x38f   : > { %v899_v20 = vmul.f32 %v898_v19, %v2895_v59 }
 0x391   : > { %v908_v21 = vadd.f32 1e-05, %v899_v20 }
 0x393   : > { %1828 = vrsqrt.f32 %v908_v21 }
 0x39d   : > { %v1829_v25 = vpop.eup %1828 }
 0x39e   : > { %v910_v27 = vmul.f32 %v1829_v25, %v906_v23  ;;  %v911_v28 = vmul.f32 %v1829_v25, %v907_v24 }
 0x3a0   : > { %v918_v29 = vadd.f32 %v2911_v26, %v910_v27  ;;  %v919_v30 = vadd.f32 %v2911_v26, %v911_v28 }
 0x3a2   : > { %v1813_v31 = vpack.i.bf16 %v919_v30, %v918_v29  ;;  %v929_v32 = vpack.c.bf16 %v919_v30, %v918_v29 }
 0x3a4   : > { %1814 = vrot.lane.b32.xlu1 %v1813_v31, %s2316_s24  ;;  %1591 = vmatpush3.bf16.msra.mxu0 %v929_v32 }
 0x3a5   : > { %1626 = vmatprep.subr.bf16.mxu0 %v2317_v50 }
 0x3a7   : > { %1593 = vmatmul.mubr.msk.bf16.vlgmr.msra.gmra.mrb[4].mxu0 %vm735_vm1, %v2857_v6  ;;  %v1825_v6 = vld [vmem:[#allocation12 + $0x18] sm:$0xff]  }
 0x3a8   : > { %1105 = vperm.xlu1 %1812, %v1102_v33   ;;  %1616 = vmatprep.mubr.msk.f32.mxu0 %vm2312_vm0, %v2311_v1 }
 0x3a9   : > { %1603 = vmatpush3.bf16.msra.mxu1 %v1825_v6  ;;  %1628 = vmatpush3.bf16.msra.mxu0 %v1627_v51 }
 0x3aa   : > { %1629 = vmatprep.subr.bf16.mxu0 %v2317_v50 }
 0x3ac   : > { %1108 = vperm.xlu1 %1812, %v1103_v34  }
 0x3ad   : > { %1631 = vmatpush3.bf16.msra.mxu0 %v1630_v53 }
 0x3ae   : > { %1632 = vmatprep.subr.bf16.mxu0 %v2317_v50 }
 0x416   : > { %v1815_v9 = vpop.permute.xlu1 %1814 }
 0x417   : > { %v1817_v39 = vunpack.i.h.bf16 %v1815_v9  ;;  %v1816_v40 = vunpack.i.l.bf16 %v1815_v9 }
 0x427   : > { %v1106_v6 = vpop.permute.xlu1 %1105 }
 0x428   : > { %vm1110_vm7 = vcmp.eq.s32.totalorder %v1106_v6, 1 }
 0x47a   : > { %v964_v38 = vpop.f32.mrb[4].mxu0 }
 0x47b   : > { %v1594_v14 = vpop.f32.mrb[5].mxu0  ;;  %v979_v42 = vsel %vm809_vm3, %v964_v38, %v1816_v40  ;;  %v1109_v38 = vpop.permute.xlu1 %1108 }
 0x47c   : > { %v967_v41 = vpop.f32.mrb[6].mxu0  ;;  %vm1111_vm8 = vcmp.eq.s32.totalorder %v1109_v38, 1 }
 0x47d   : > { %v980_v43 = vsel %vm809_vm3, %v967_v41, %v1817_v39  ;;  %v1595_v44 = vpop.f32.mrb[7].mxu0 }
 0x47e   : > { %v981_v46 = vpack.c.bf16 %v980_v43, %v979_v42 }
 0x480   : > { %1605 = vmatmul.mubr.msk.bf16.vlgmr.msra.gmra.mrb[4].mxu1 %vm1012_vm6, %v981_v46 }
 0x553   : > { %v1050_v55 = vpop.f32.mrb[4].mxu1 }
 0x554   : > { %v1051_v57 = vadd.f32 %v1542_v54, %v1050_v55  ;;  %v1606_v60 = vpop.f32.mrb[5].mxu1 }
 0x555   : > { %v1053_v62 = vpop.f32.mrb[6].mxu1 }
 0x556   : > { %v1057_v63 = vmax.f32 %v1051_v57, 0.0  ;;  %v1054_v0 = vadd.f32 %v1542_v54, %v1053_v62  ;;  %v1607_v2 = vpop.f32.mrb[7].mxu1  ;;  %v1127_v54 = vld [vmem:[#allocation21] sm:$0x1] }
 0x558   : > { %v1059_v3 = vmul.f32 %v1057_v63, %v2883_v35  ;;  %v1058_v4 = vmax.f32 %v1054_v0, 0.0 }
 0x55a   : > { %v1060_v5 = vmul.f32 %v1058_v4, %v2886_v45  ;;  %v1061_v7 = vsel %vm809_vm3, %v1059_v3, 0.0 }
 0x55c   : > { %v1062_v10 = vsel %vm809_vm3, %v1060_v5, 0.0 }
 0x55d   : > { %v1063_v11 = vadd.f32 %v1062_v10, %v1061_v7 }
 0x55f   : > { %v1064_v12 = vrot.slane %v1063_v11, 4 }
 0x561   : > { %v1065_v13 = vadd.f32 %v1064_v12, %v1063_v11 }
 0x563   : > { %v1066_v15 = vrot.slane %v1065_v13, 2 }
 0x565   : > { %v1067_v16 = vadd.f32 %v1066_v15, %v1065_v13 }
 0x567   : > { %v1068_v17 = vrot.slane %v1067_v16, 1 }
 0x569   : > { %v1069_v18 = vadd.f32 %v1068_v17, %v1067_v16 }
 0x56b   : > { %v1070_v19 = vmul.f32 %v1069_v18, %v2895_v59 }
 0x56d   : > { %v1071_v20 = vmul.f32 %v1070_v19, %v2893_v58 }
 0x56f   : > { %v1075_v21 = vrot.slane %v1071_v20, %v882_v61 }
 0x571   : > { %v1076_v23 = vsub.f32 %v1057_v63, %v1075_v21  ;;  %v1077_v24 = vsub.f32 %v1058_v4, %v1075_v21  ;;  %v1204_v63 = vld [vmem:[#allocation2] sm:$0x1] }
 0x573   : > { %v1078_v25 = vmul.f32 %v1076_v23, %v1076_v23  ;;  %v1079_v27 = vmul.f32 %v1077_v24, %v1077_v24 }
 0x575   : > { %v1080_v28 = vmul.f32 %v1078_v25, %v2883_v35  ;;  %v1081_v29 = vmul.f32 %v1079_v27, %v2886_v45  ;;  %v1092_v35 = vmul.f32 %v2907_v22, %v1076_v23  ;;  %v1093_v45 = vmul.f32 %v2907_v22, %v1077_v24 }
 0x577   : > { %v1082_v30 = vsel %vm809_vm3, %v1080_v28, 0.0  ;;  %v1083_v31 = vsel %vm809_vm3, %v1081_v29, 0.0 }
 0x578   : > { %v1084_v32 = vadd.f32 %v1083_v31, %v1082_v30 }
 0x57a   : > { %v1085_v33 = vrot.slane %v1084_v32, 4 }
 0x57c   : > { %v1086_v34 = vadd.f32 %v1085_v33, %v1084_v32 }
 0x57e   : > { %v1087_v36 = vrot.slane %v1086_v34, 2 }
 0x580   : > { %v1088_v58 = vadd.f32 %v1087_v36, %v1086_v34 }
 0x582   : > { %v1089_v8 = vrot.slane %v1088_v58, 1 }
 0x584   : > { %v1090_v56 = vadd.f32 %v1089_v8, %v1088_v58 }
 0x586   : > { %v1091_v61 = vmul.f32 %v1090_v56, %v2895_v59 }
 0x588   : > { %v1094_v37 = vadd.f32 1e-05, %v1091_v61 }
 0x58a   : > { %1830 = vrsqrt.f32 %v1094_v37 }
 0x594   : > { %v1831_v9 = vpop.eup %1830 }
 0x595   : > { %v1096_v39 = vmul.f32 %v1831_v9, %v1092_v35  ;;  %v1097_v40 = vmul.f32 %v1831_v9, %v1093_v45 }
 0x597   : > { %v1098_v14 = vadd.f32 %v2911_v26, %v1096_v39  ;;  %v1099_v41 = vadd.f32 %v2911_v26, %v1097_v40  ;;  %v1202_v26 = vld [vmem:[#allocation23] sm:$0xff] }
 0x598   : > { %v1633_v53 = vpack.c.bf16 %v1203_v52, %v1202_v26 }
 0x599   : > { %v1112_v42 = vsel %vm1110_vm7, %v1098_v14, -3.4028235e+38  ;;  %v1113_v43 = vsel %vm1111_vm8, %v1099_v41, -3.4028235e+38 }
 0x59a   : > { %v1114_v59 = vsel %vm809_vm3, %v1112_v42, -inf  ;;  %v1115_v44 = vsel %vm809_vm3, %v1113_v43, -inf }
 0x59b   : > { %v1116_v46 = vmax.f32 %v1114_v59, %v1115_v44 }
 0x59d   : > { %v1117_v47 = vrot.slane %v1116_v46, 4 }
 0x59f   : > { %v1118_v48 = vmax.f32 %v1116_v46, %v1117_v47 }
 0x5a1   : > { %v1119_v22 = vrot.slane %v1118_v48, 2 }
 0x5a3   : > { %v1120_v49 = vmax.f32 %v1118_v48, %v1119_v22 }
 0x5a5   : > { %v1121_v50 = vrot.slane %v1120_v49, 1 }
 0x5a7   : > { %v1122_v51 = vmax.f32 %v1120_v49, %v1121_v50 }
 0x5a9   : > { %1617 = vmatmul.mubr.msk.f32.vlgmr.msra.gmra.mrb[8].mxu0 %vm809_vm3, %v1122_v51 }
 0x5aa   : > { %1623 = vmatprep.mubr.msk.f32.mxu0 %vm2312_vm0, %v2311_v1  ;;  %1634 = vmatpush3.bf16.msra.mxu0 %v1633_v53 }
 0x67c   : > { %v1197_v55 = vpop.f32.mrb[8].mxu0 }
 0x67d   : > { %v1198_v57 = vadd.f32 %v1197_v55, %v1127_v54  ;;  %v1618_v60 = vpop.f32.mrb[9].mxu0 }
 0x67f   : > { %v1201_v62 = vmax.f32 %v1198_v57, 0.0 }
 0x681   : > { %1624 = vmatmul.mubr.msk.f32.vlgmr.msra.gmra.mrb[10].mxu0 %vm735_vm1, %v1201_v62 }
 0x754   : > { %v1274_v0 = vpop.f32.mrb[10].mxu0 }
 0x755   : > { %v1275_v1 = vadd.f32 %v1274_v0, %v1204_v63  ;;  %v1625_v2 = vpop.f32.mrb[11].mxu0 }
 0x757   : > { %1279 = vst.msk [vmem:[%s696_s29] sm:$0x1] %vm1278_vm9, %v1275_v1 }
 0x758   : > { %2215 = shalt.err (!%p2212_p4)
}
 0x759   : > { %s2216_s13 = scalar_lea.hbm %s2956_s14, 16  ;;  %s2220_s30 = scalar_lea.hbm %s3091_s11, 64 }
 0x75a   : > { %p2217_p6 = scmp.ne.s32.totalorder %s2956_s14, %s2216_s13  ;;  %p2221_p9 = scmp.lt.u32.totalorder %s2956_s14, %s3091_s11 }
 0x75b   : > { %p2222_p12 = scmp.lt.u32.totalorder %s2220_s30, %s2216_s13  ;;  %p2224_p10 = scmp.lt.u32.totalorder %s2216_s13, %s2956_s14 }
 0x75c   : > { %p2218_p7 = pnand %p2217_p6, %p3092_p11 }
 0x75d   : > { %p2223_p0 = por %p2222_p12, %p2221_p9 }
 0x75e   : > { %p2219_p1 = pneg %p2218_p7 }
 0x75f   : > { %p2225_p5 = por %p2224_p10, %p2223_p0 }
 0x761   : > { %p2226_p2 = pnand %p2225_p5, %p2219_p1 }
 0x763   : > { %2229 = shalt.err (!%p2226_p2)
}
 0x764   : > { %1685 = dma.vmem_to_hbm [thread:$0]  (%p3092_p11), %s2958_s3, 16, %s2956_s14, %s1281_s0  }
 0x765 PF: > { %s3093_s25 = sld [smem:[#allocation37_spill]]  ;;  %p1753_p8 = scmp.ge.s32.totalorder %s2292_s18, 2 }
 0x766   : > { %s1305_s22 = sand.u32 1, %s2280_s15  }
 0x767   : > { %s1306_s24 = scalar_lea.sflag [#allocation5], %s1305_s22 }
 0x76b   : > { %p3094_p13 = scmp.ne.s32.totalorder %s3093_s25, 0 }
 0x76d   : > { %p1729_p3 = pnand %p1753_p8, %p3094_p13 }
 0x76f   : > { %2275 = dma.done.wait (!%p1729_p3), %s1306_s24, 16  }
 0x770   : > { %2277 = vsyncadd (!%p1729_p3), %s1306_s24, 4294967280  ;;  %s3095_s18 = sld [smem:[#allocation35_spill]]  ;;  %s3096_s19 = sld [smem:[#allocation33_spill]] }
 0x771   : > { %s3097_s17 = sld [smem:[#allocation36_spill]]  ;;  %s3098_s15 = smov %s2284_s16 }
 0x776   : > { %p37_p4 = scmp.ge.s32.totalorder %s3095_s18, 6   ;;  %s3099_s16 = smov %s3096_s19 }
 0x778   :  { %39 = sbr.rel (!%p37_p4) target bundleno = 24 (0x18), region = 185 }
 0x77f   :  { %1310 = vsyncpa [#allocation4], 1 }
 0x780   :  { %1312 = vsyncpa [#allocation4 + $0x1], 1 }
 0x781   :  { %1313 = vsyncpa [#allocation7], 1 }
 0x782   :  { %1315 = vsyncpa [#allocation7 + $0x1], 1 }
 0x783   :  { %1316 = vsyncpa [#allocation10], 1 }
 0x784   :  { %1317 = vsyncpa [#allocation13], 1 }
 0x785   :  { %1318 = vsyncpa [#allocation16], 1 }
 0x786   :  { %1319 = vsyncpa [#allocation19], 1 }
 0x787   :  { %1320 = vsyncpa [#allocation22], 1 }
 0x788   :  { %1321 = vsyncpa [#allocation5], 1 }
 0x789   :  { %1323 = vsyncpa [#allocation5 + $0x1], 1 }

</bundles_post_ra>
